<compile_context>
chip_gen: v7x
topology: tpu7x:2x2x1
jax: 0.10.0
libtpu: 0.0.40
codegen_flags: <defaults>
</compile_context>

<pallas_src>
import jax
import jax.numpy as jnp
from jax.experimental import pallas as pl
from jax.experimental.pallas import tpu as pltpu


def _relu_conv1x1_kernel(x_ref, w_ref, o_ref):
    # x_ref: (C_in, HW)  f32   -- invariant across the C_out grid axis
    # w_ref: (tco, C_in) bf16  -- streamed weight tile
    # o_ref: (tco, HW)   f32   -- output tile
    x = jnp.maximum(x_ref[...], 0.0).astype(jnp.bfloat16)      # fused ReLU + cast (VPU)
    o_ref[...] = jnp.dot(w_ref[...], x,
                         preferred_element_type=jnp.float32).astype(o_ref.dtype)


def _pick_block_co(c_out: int, target: int) -> int:
    """Largest multiple-of-8 divisor of c_out <= 512 (prefer `target` if it divides)."""
    if c_out % target == 0:
        return target
    best = c_out  # single-tile fallback is always legal
    for d in range(8, min(c_out, 512) + 1, 8):
        if c_out % d == 0:
            best = d
    return best


def relu_conv1x1(x_nchw: jax.Array, weight_oihw: jax.Array, *, block_co: int = 336) -> jax.Array:
    """ReLU followed by a bias-free 1x1 conv (stride 1), matching PyTorch semantics."""
    N, C_in, H, W = x_nchw.shape
    C_out = weight_oihw.shape[0]
    assert weight_oihw.shape == (C_out, C_in, 1, 1)
    HW = H * W

    # Free reshapes only -- no transposes.
    x_r = x_nchw.reshape(N, C_in, HW)
    # (C_out, C_in, 1, 1) -> (C_out, C_in), bf16 to halve the dominant weight HBM traffic.
    # (In a real model this cast is amortized / done once at init.)
    w = weight_oihw.reshape(C_out, C_in).astype(jnp.bfloat16)

    block_co = _pick_block_co(C_out, block_co)
    grid = (N, C_out // block_co)

    out = pl.pallas_call(
        _relu_conv1x1_kernel,
        out_shape=jax.ShapeDtypeStruct((N, C_out, HW), x_nchw.dtype),
        grid_spec=pltpu.PrefetchScalarGridSpec(
            num_scalar_prefetch=0,
            grid=grid,
            in_specs=[
                # Full activation block, resident across the C_out axis (constant index).
                pl.BlockSpec((None, C_in, HW), lambda n, j: (n, 0, 0)),
                # Weight streamed in C_out tiles (double-buffered by the pipeline).
                pl.BlockSpec((block_co, C_in), lambda n, j: (j, 0)),
            ],
            out_specs=pl.BlockSpec((None, block_co, HW), lambda n, j: (n, j, 0)),
        ),
        compiler_params=pltpu.CompilerParams(
            # Both axes independent; on multi-TC chips the C_out axis is split so each
            # core only reads its own slice of the weight.
            dimension_semantics=("parallel", "parallel"),
        ),
    )(x_r, w)

    return out.reshape(N, C_out, H, W)


if __name__ == "__main__":
    # Shapes implied by the module: input (1, 1344, 14, 14), weight (1344, 1344, 1, 1)
    N, C, H, W = 1, 1344, 14, 14

    key = jax.random.PRNGKey(0)
    kx, kw = jax.random.split(key)
    x = jax.random.normal(kx, (N, C, H, W), dtype=jnp.float32)
    bound = 1.0 / (C ** 0.5)
    weight = jax.random.uniform(kw, (C, C, 1, 1), dtype=jnp.float32,
                                minval=-bound, maxval=bound)

    fn = jax.jit(relu_conv1x1)
    out = jax.block_until_ready(fn(x, weight))
    assert out.shape == (N, C, H, W)
    assert out.dtype == x.dtype

    # 1) Matched-precision reference (bf16 inputs, f32 accumulate) -- validates the kernel.
    x_bf = jnp.maximum(x, 0.0).astype(jnp.bfloat16)
    w_bf = weight.reshape(C, C).astype(jnp.bfloat16)
    ref_bf = jnp.einsum("oc,nchw->nohw", w_bf, x_bf,
                        preferred_element_type=jnp.float32)
    assert jnp.allclose(out, ref_bf, atol=1e-3, rtol=1e-3)

    # 2) Full-f32 reference -- semantics sanity check (bf16 weight adds ~1e-3-scale noise).
    ref_f32 = jnp.einsum("oc,nchw->nohw", weight.reshape(C, C), jnp.maximum(x, 0.0))
    assert jnp.allclose(out, ref_f32, atol=2e-2, rtol=2e-2)

    print("KERNEL_OK")
</pallas_src>

<mosaic_0001>
module attributes {stable_mosaic.version = 11 : i64} {
  func.func @_relu_conv1x1_kernel(%arg0: i32, %arg1: i32, %arg2: memref<1x1344x196xf32, #tpu.memory_space<vmem>>, %arg3: memref<336x1344xbf16, #tpu.memory_space<vmem>>, %arg4: memref<1x336x196xf32, #tpu.memory_space<vmem>>) attributes {dimension_semantics = [#tpu.dimension_semantics<parallel>, #tpu.dimension_semantics<parallel>], iteration_bounds = array<i64: 1, 4>, scalar_prefetch = 0 : i64, scratch_operands = 0 : i64, tpu.core_type = #tpu.core_type<tc>, window_params = [{transform_indices = @transform_0, window_bounds = array<i64: 1, 1344, 196>}, {transform_indices = @transform_1, window_bounds = array<i64: 336, 1344>}, {transform_indices = @transform_2, window_bounds = array<i64: 1, 336, 196>}]} {
    %c0 = arith.constant 0 : index
    %c0_0 = arith.constant 0 : index
    %c0_1 = arith.constant 0 : index
    %0 = vector.load %arg2[%c0, %c0_0, %c0_1] : memref<1x1344x196xf32, #tpu.memory_space<vmem>>, vector<1x1344x196xf32>
    %1 = vector.shape_cast %0 : vector<1x1344x196xf32> to vector<1344x196xf32>
    %cst = arith.constant 0.000000e+00 : f32
    %2 = vector.broadcast %cst : f32 to vector<1344x196xf32>
    %3 = arith.maximumf %1, %2 : vector<1344x196xf32>
    %4 = arith.truncf %3 : vector<1344x196xf32> to vector<1344x196xbf16>
    %c0_2 = arith.constant 0 : index
    %c0_3 = arith.constant 0 : index
    %5 = vector.load %arg3[%c0_2, %c0_3] : memref<336x1344xbf16, #tpu.memory_space<vmem>>, vector<336x1344xbf16>
    %cst_4 = arith.constant dense<0.000000e+00> : vector<336x196xf32>
    %6 = tpu.matmul %5, %4, %cst_4 {dimension_numbers = #tpu.dot_dimension_numbers<[1], [0], [0], [1], [0, 0, 1, 1], [], []>} : vector<336x1344xbf16>, vector<1344x196xbf16>, vector<336x196xf32> -> vector<336x196xf32>
    %c0_5 = arith.constant 0 : index
    %c0_6 = arith.constant 0 : index
    %c0_7 = arith.constant 0 : index
    %7 = vector.load %arg4[%c0_5, %c0_6, %c0_7] : memref<1x336x196xf32, #tpu.memory_space<vmem>>, vector<1x336x196xf32>
    %8 = vector.shape_cast %7 : vector<1x336x196xf32> to vector<336x196xf32>
    %9 = vector.shape_cast %6 : vector<336x196xf32> to vector<1x336x196xf32>
    tpu.vector_store %arg4[%c0_5, %c0_6, %c0_7], %9 {strides = array<i32>} : memref<1x336x196xf32, #tpu.memory_space<vmem>>, vector<1x336x196xf32>,
    return
  }
  func.func @transform_0(%arg0: i32, %arg1: i32) -> (i32, i32, i32) {
    %c0_i32 = arith.constant 0 : i32
    %c0_i32_0 = arith.constant 0 : i32
    %c0_i32_1 = arith.constant 0 : i32
    return %arg0, %c0_i32, %c0_i32_0 : i32, i32, i32
  }
  func.func @transform_1(%arg0: i32, %arg1: i32) -> (i32, i32) {
    %c0_i32 = arith.constant 0 : i32
    %c0_i32_0 = arith.constant 0 : i32
    return %arg1, %c0_i32 : i32, i32
  }
  func.func @transform_2(%arg0: i32, %arg1: i32) -> (i32, i32, i32) {
    %c0_i32 = arith.constant 0 : i32
    %c0_i32_0 = arith.constant 0 : i32
    return %arg0, %arg1, %c0_i32 : i32, i32, i32
  }
}

</mosaic_0001>

<bundles_post_ra>
// kernel: relu_conv1x1.1
= control target key start
LH: loop header
LB: loop body
LE: loop exit
PB: predicated region body
PF: predicated region fallthrough
CT: control target
= control target key end

     0   :  { %s5237_s9 = smov 0   ;;  %s5239_s10 = smov 0   ;;  %s6698_s0 = inlined_call_operand.vmem [shape: f32[1,1344,196], index: 0, kind: input, shape index: {}]   ;;  %s6699_s1 = inlined_call_operand.vmem [shape: bf16[1344,1344], index: 1, kind: input, shape index: {}]   ;;  %s6700_s2 = inlined_call_operand.vmem [shape: f32[1,1344,196], index: 2, kind: output, shape index: {}]  }
   0x1   :  { %s5241_s11 = smov 0  }
   0x2 LB: > { %s21_s12 = sadd.s32 1, %s5215_s10  ;;  %p4156_p0 = scmp.ge.s32.totalorder %s5219_s11, 1  ;;  %s5219_s11 = sphi %s5241_s11, %s12_s11   ;;  %s5215_s10 = sphi %s5239_s10, %s6703_s10   ;;  %s5211_s9 = sphi %s5237_s9, %s6702_s9  }
   0x3   : > { %p22_p1 = scmp.ge.s32.totalorder %s21_s12, 4  ;;  %p138_p2 = scmp.lt.s32.totalorder %s5219_s11, 5 }
   0x5   : > { %s6705_s12 = smov (%p22_p1, %s21_s12), 0  ;;  %p139_p3 = pnand %p4156_p0, %p138_p2 }
   0x6   : > { %v196_v0 = vld [vmem:[%s6698_s0 + $0x8] sm:$0xff] (!%p139_p3)  ;;  %v198_v1 = vld [vmem:[%s6698_s0 + $0x18] sm:$0xff] (!%p139_p3)  ;;  %v195_v7 = vld [vmem:[%s6698_s0] sm:$0xff] (!%p139_p3)  ;;  %s176_s3 = smul.u32 (!%p139_p3), 42, %s5211_s9  ;;  %vm2442_vm0 = vcmask (!%p139_p3), 523264   ;;  %vm3965_vm1 = vcmask (!%p139_p3), 556032  }
   0x7   : > { %142 = sbr.rel (%p139_p3) target bundleno = 790 (0x316), region = 28  ;;  %v388_v2 = vld [vmem:[%s6698_s0 + $0x608] sm:$0xff] (!%p139_p3)  ;;  %v532_v3 = vmax.f32 (!%p139_p3), %v196_v0, 0.0  ;;  %v534_v4 = vmax.f32 (!%p139_p3), %v198_v1, 0.0  ;;  %v390_v5 = vld [vmem:[%s6698_s0 + $0x618] sm:$0xff] (!%p139_p3)  ;;  %v197_v8 = vld [vmem:[%s6698_s0 + $0x10] sm:$0xff] (!%p139_p3) }
   0x8   : > { %v724_v6 = vmax.f32 (!%p139_p3), %v388_v2, 0.0  ;;  %v726_v9 = vmax.f32 (!%p139_p3), %v390_v5, 0.0  ;;  %v531_v10 = vmax.f32 (!%p139_p3), %v195_v7, 0.0  ;;  %v533_v11 = vmax.f32 (!%p139_p3), %v197_v8, 0.0  ;;  %v387_v12 = vld [vmem:[%s6698_s0 + $0x600] sm:$0xff] (!%p139_p3)  ;;  %v389_v13 = vld [vmem:[%s6698_s0 + $0x610] sm:$0xff] (!%p139_p3) }
   0x9   : > { %v200_v14 = vld [vmem:[%s6698_s0 + $0x28] sm:$0xff] (!%p139_p3)  ;;  %v868_v15 = vpack.c.bf16 (!%p139_p3), %v534_v4, %v532_v3  ;;  %v723_v16 = vmax.f32 (!%p139_p3), %v387_v12, 0.0  ;;  %v725_v17 = vmax.f32 (!%p139_p3), %v389_v13, 0.0  ;;  %v202_v18 = vld [vmem:[%s6698_s0 + $0x38] sm:$0xff] (!%p139_p3)  ;;  %v199_v26 = vld [vmem:[%s6698_s0 + $0x20] sm:$0xff] (!%p139_p3)  ;;  %p5488_p4 = scmp.lt.s32.totalorder (!%p139_p3), %s176_s3, 167 }
   0xa   : > { %v536_v19 = vmax.f32 (!%p139_p3), %v200_v14, 0.0  ;;  %v392_v20 = vld [vmem:[%s6698_s0 + $0x628] sm:$0xff] (!%p139_p3)  ;;  %v394_v21 = vld [vmem:[%s6698_s0 + $0x638] sm:$0xff] (!%p139_p3)  ;;  %v964_v22 = vpack.c.bf16 (!%p139_p3), %v726_v9, %v724_v6  ;;  %v867_v23 = vpack.c.bf16 (!%p139_p3), %v533_v11, %v531_v10  ;;  %v538_v24 = vmax.f32 (!%p139_p3), %v202_v18, 0.0  ;;  %v201_v27 = vld [vmem:[%s6698_s0 + $0x30] sm:$0xff] (!%p139_p3) }
   0xb   : > { %v728_v25 = vmax.f32 (!%p139_p3), %v392_v20, 0.0  ;;  %v391_v28 = vld [vmem:[%s6698_s0 + $0x620] sm:$0xff] (!%p139_p3)  ;;  %2506 = vmatprep.subr.bf16.mxu1 (!%p139_p3), %v868_v15  ;;  %v963_v29 = vpack.c.bf16 (!%p139_p3), %v725_v17, %v723_v16  ;;  %v730_v30 = vmax.f32 (!%p139_p3), %v394_v21, 0.0  ;;  %v535_v31 = vmax.f32 (!%p139_p3), %v199_v26, 0.0  ;;  %v393_v33 = vld [vmem:[%s6698_s0 + $0x630] sm:$0xff] (!%p139_p3)  ;;  %v204_v34 = vld [vmem:[%s6698_s0 + $0x48] sm:$0xff] (!%p139_p3) }
   0xc   : > { %v537_v32 = vmax.f32 (!%p139_p3), %v201_v27, 0.0  ;;  %v206_v35 = vld [vmem:[%s6698_s0 + $0x58] sm:$0xff] (!%p139_p3)  ;;  %3235 = vmatprep.subr.bf16.mxu0 (!%p139_p3), %v964_v22  ;;  %2507 = vmatpush1.bf16.msra.mxu1 (!%p139_p3), %v867_v23  ;;  %v870_v36 = vpack.c.bf16 (!%p139_p3), %v538_v24, %v536_v19  ;;  %v727_v37 = vmax.f32 (!%p139_p3), %v391_v28, 0.0  ;;  %v729_v38 = vmax.f32 (!%p139_p3), %v393_v33, 0.0  ;;  %v396_v40 = vld [vmem:[%s6698_s0 + $0x648] sm:$0xff] (!%p139_p3)  ;;  %v203_v42 = vld [vmem:[%s6698_s0 + $0x40] sm:$0xff] (!%p139_p3) }
   0xd   : > { %v540_v39 = vmax.f32 (!%p139_p3), %v204_v34, 0.0  ;;  %v398_v41 = vld [vmem:[%s6698_s0 + $0x658] sm:$0xff] (!%p139_p3)  ;;  %3236 = vmatpush1.bf16.msra.mxu0 (!%p139_p3), %v963_v29  ;;  %v966_v43 = vpack.c.bf16 (!%p139_p3), %v730_v30, %v728_v25  ;;  %v542_v45 = vmax.f32 (!%p139_p3), %v206_v35, 0.0  ;;  %v732_v46 = vmax.f32 (!%p139_p3), %v396_v40, 0.0  ;;  %v205_v47 = vld [vmem:[%s6698_s0 + $0x50] sm:$0xff] (!%p139_p3)  ;;  %v395_v48 = vld [vmem:[%s6698_s0 + $0x640] sm:$0xff] (!%p139_p3) }
   0xe   : > { %v869_v44 = vpack.c.bf16 %v537_v32, %v535_v31  ;;  %v397_v49 = vld [vmem:[%s6698_s0 + $0x650] sm:$0xff]  ;;  %2508 = vmatprep.subr.bf16.mxu1 %v870_v36  ;;  %v965_v50 = vpack.c.bf16 %v729_v38, %v727_v37  ;;  %v734_v51 = vmax.f32 %v398_v41, 0.0  ;;  %v539_v52 = vmax.f32 %v203_v42, 0.0  ;;  %v208_v54 = vld [vmem:[%s6698_s0 + $0x68] sm:$0xff]  ;;  %v210_v55 = vld [vmem:[%s6698_s0 + $0x78] sm:$0xff]  ;;  %s6707_s3 = smov (!%p5488_p4, %s176_s3), 167 }
   0xf   : > { %v541_v53 = vmax.f32 %v205_v47, 0.0  ;;  %v400_v56 = vld [vmem:[%s6698_s0 + $0x668] sm:$0xff]  ;;  %3237 = vmatprep.subr.bf16.mxu0 %v966_v43  ;;  %v872_v57 = vpack.c.bf16 %v542_v45, %v540_v39  ;;  %v731_v58 = vmax.f32 %v395_v48, 0.0  ;;  %v733_v59 = vmax.f32 %v397_v49, 0.0  ;;  %v402_v61 = vld [vmem:[%s6698_s0 + $0x678] sm:$0xff]  ;;  %v207_v62 = vld [vmem:[%s6698_s0 + $0x60] sm:$0xff] }
  0x10   : > { %v544_v60 = vmax.f32 %v208_v54, 0.0  ;;  %v209_v63 = vld [vmem:[%s6698_s0 + $0x70] sm:$0xff]  ;;  %2509 = vmatpush1.bf16.msra.mxu1 %v869_v44  ;;  %v968_v0 = vpack.c.bf16 %v734_v51, %v732_v46  ;;  %v546_v2 = vmax.f32 %v210_v55, 0.0  ;;  %v736_v3 = vmax.f32 %v400_v56, 0.0  ;;  %v399_v4 = vld [vmem:[%s6698_s0 + $0x660] sm:$0xff]  ;;  %v212_v6 = vld [vmem:[%s6698_s0 + $0x88] sm:$0xff] }
  0x11   : > { %v871_v1 = vpack.c.bf16 %v541_v53, %v539_v52  ;;  %v401_v5 = vld [vmem:[%s6698_s0 + $0x670] sm:$0xff]  ;;  %3238 = vmatpush1.bf16.msra.mxu0 %v965_v50  ;;  %2510 = vmatprep.subr.bf16.mxu1 %v872_v57  ;;  %v967_v7 = vpack.c.bf16 %v733_v59, %v731_v58  ;;  %v738_v8 = vmax.f32 %v402_v61, 0.0  ;;  %v543_v9 = vmax.f32 %v207_v62, 0.0  ;;  %v214_v11 = vld [vmem:[%s6698_s0 + $0x98] sm:$0xff]  ;;  %v404_v12 = vld [vmem:[%s6698_s0 + $0x688] sm:$0xff]  ;;  %s4835_s6 = smul.u32 44, %s6707_s3 }
  0x12   : > { %v545_v10 = vmax.f32 %v209_v63, 0.0  ;;  %v406_v13 = vld [vmem:[%s6698_s0 + $0x698] sm:$0xff]  ;;  %3239 = vmatprep.subr.bf16.mxu0 %v968_v0  ;;  %v874_v14 = vpack.c.bf16 %v546_v2, %v544_v60  ;;  %v735_v15 = vmax.f32 %v399_v4, 0.0  ;;  %v737_v16 = vmax.f32 %v401_v5, 0.0  ;;  %v211_v18 = vld [vmem:[%s6698_s0 + $0x80] sm:$0xff]  ;;  %v213_v19 = vld [vmem:[%s6698_s0 + $0x90] sm:$0xff] }
  0x13   : > { %v548_v17 = vmax.f32 %v212_v6, 0.0  ;;  %v403_v20 = vld [vmem:[%s6698_s0 + $0x680] sm:$0xff]  ;;  %v970_v21 = vpack.c.bf16 %v738_v8, %v736_v3  ;;  %v550_v23 = vmax.f32 %v214_v11, 0.0  ;;  %v740_v24 = vmax.f32 %v404_v12, 0.0  ;;  %v405_v25 = vld [vmem:[%s6698_s0 + $0x690] sm:$0xff]  ;;  %v216_v26 = vld [vmem:[%s6698_s0 + $0xa8] sm:$0xff]  ;;  %s5586_s8 = scalar_lea.vmem %s6699_s1, %s4835_s6 }
  0x14   : > { %v873_v22 = vpack.c.bf16 %v545_v10, %v543_v9  ;;  %v218_v27 = vld [vmem:[%s6698_s0 + $0xb8] sm:$0xff]  ;;  %2511 = vmatpush1.bf16.msra.mxu1 %v871_v1  ;;  %v969_v28 = vpack.c.bf16 %v737_v16, %v735_v15  ;;  %v742_v29 = vmax.f32 %v406_v13, 0.0  ;;  %v547_v30 = vmax.f32 %v211_v18, 0.0  ;;  %v408_v32 = vld [vmem:[%s6698_s0 + $0x6a8] sm:$0xff]  ;;  %v215_v34 = vld [vmem:[%s6698_s0 + $0xa0] sm:$0xff]  ;;  %s4414_s6 = sshll.u32 %s6707_s3, 4 }
  0x15   : > { %v549_v31 = vmax.f32 %v213_v19, 0.0  ;;  %v410_v33 = vld [vmem:[%s6698_s0 + $0x6b8] sm:$0xff]  ;;  %3240 = vmatpush1.bf16.msra.mxu0 %v967_v7  ;;  %2512 = vmatprep.subr.bf16.mxu1 %v874_v14  ;;  %v876_v35 = vpack.c.bf16 %v550_v23, %v548_v17  ;;  %v739_v36 = vmax.f32 %v403_v20, 0.0  ;;  %v741_v37 = vmax.f32 %v405_v25, 0.0  ;;  %v217_v39 = vld [vmem:[%s6698_s0 + $0xb0] sm:$0xff]  ;;  %v407_v40 = vld [vmem:[%s6698_s0 + $0x6a0] sm:$0xff]  ;;  %s6561_s19 = scalar_lea.vmem %s6700_s2, %s4414_s6 }
  0x16   : > { %v552_v38 = vmax.f32 %v216_v26, 0.0  ;;  %3241 = vmatprep.subr.bf16.mxu0 %v970_v21  ;;  %v972_v41 = vpack.c.bf16 %v742_v29, %v740_v24  ;;  %v554_v42 = vmax.f32 %v218_v27, 0.0  ;;  %v744_v43 = vmax.f32 %v408_v32, 0.0  ;;  %v409_v44 = vld [vmem:[%s6698_s0 + $0x6b0] sm:$0xff]  ;;  %v220_v45 = vld [vmem:[%s6698_s0 + $0xc8] sm:$0xff]  ;;  %v222_v46 = vld [vmem:[%s6698_s0 + $0xd8] sm:$0xff] }
  0x17   : > { %v746_v47 = vmax.f32 %v410_v33, 0.0  ;;  %v551_v48 = vmax.f32 %v215_v34, 0.0  ;;  %v553_v49 = vmax.f32 %v217_v39, 0.0  ;;  %v412_v50 = vld [vmem:[%s6698_s0 + $0x6c8] sm:$0xff]  ;;  %v414_v51 = vld [vmem:[%s6698_s0 + $0x6d8] sm:$0xff]  ;;  %v875_v52 = vpack.c.bf16 %v549_v31, %v547_v30  ;;  %v219_v55 = vld [vmem:[%s6698_s0 + $0xc0] sm:$0xff] }
  0x18   : > { %2513 = vmatpush1.bf16.msra.mxu1 %v873_v22  ;;  %v971_v53 = vpack.c.bf16 %v741_v37, %v739_v36  ;;  %v743_v54 = vmax.f32 %v407_v40, 0.0  ;;  %v221_v56 = vld [vmem:[%s6698_s0 + $0xd0] sm:$0xff]  ;;  %v411_v57 = vld [vmem:[%s6698_s0 + $0x6c0] sm:$0xff]  ;;  %v878_v58 = vpack.c.bf16 %v554_v42, %v552_v38  ;;  %v745_v59 = vmax.f32 %v409_v44, 0.0  ;;  %v224_v63 = vld [vmem:[%s6698_s0 + $0xe8] sm:$0xff] }
  0x19   : > { %3242 = vmatpush1.bf16.msra.mxu0 %v969_v28  ;;  %2514 = vmatprep.subr.bf16.mxu1 %v876_v35  ;;  %v556_v60 = vmax.f32 %v220_v45, 0.0  ;;  %v558_v61 = vmax.f32 %v222_v46, 0.0  ;;  %v413_v62 = vld [vmem:[%s6698_s0 + $0x6d0] sm:$0xff]  ;;  %v226_v0 = vld [vmem:[%s6698_s0 + $0xf8] sm:$0xff]  ;;  %v974_v1 = vpack.c.bf16 %v746_v47, %v744_v43  ;;  %v748_v2 = vmax.f32 %v412_v50, 0.0  ;;  %v416_v7 = vld [vmem:[%s6698_s0 + $0x6e8] sm:$0xff] }
  0x1a   : > { %3243 = vmatprep.subr.bf16.mxu0 %v972_v41  ;;  %v750_v3 = vmax.f32 %v414_v51, 0.0  ;;  %v877_v4 = vpack.c.bf16 %v553_v49, %v551_v48  ;;  %v555_v5 = vmax.f32 %v219_v55, 0.0  ;;  %v557_v6 = vmax.f32 %v221_v56, 0.0  ;;  %v418_v8 = vld [vmem:[%s6698_s0 + $0x6f8] sm:$0xff]  ;;  %v223_v13 = vld [vmem:[%s6698_s0 + $0xe0] sm:$0xff]  ;;  %v225_v14 = vld [vmem:[%s6698_s0 + $0xf0] sm:$0xff] }
  0x1b   : > { %v747_v9 = vmax.f32 %v411_v57, 0.0  ;;  %v749_v10 = vmax.f32 %v413_v62, 0.0  ;;  %v560_v11 = vmax.f32 %v224_v63, 0.0  ;;  %v562_v12 = vmax.f32 %v226_v0, 0.0  ;;  %v415_v17 = vld [vmem:[%s6698_s0 + $0x6e0] sm:$0xff]  ;;  %v417_v21 = vld [vmem:[%s6698_s0 + $0x6f0] sm:$0xff] }
  0x1c   : > { %2515 = vmatpush1.bf16.msra.mxu1 %v875_v52  ;;  %v973_v15 = vpack.c.bf16 %v745_v59, %v743_v54  ;;  %v880_v16 = vpack.c.bf16 %v558_v61, %v556_v60  ;;  %v976_v18 = vpack.c.bf16 %v750_v3, %v748_v2  ;;  %v752_v19 = vmax.f32 %v416_v7, 0.0  ;;  %v228_v22 = vld [vmem:[%s6698_s0 + $0x108] sm:$0xff]  ;;  %v230_v23 = vld [vmem:[%s6698_s0 + $0x118] sm:$0xff]  ;;  %v227_v28 = vld [vmem:[%s6698_s0 + $0x100] sm:$0xff] }
  0x1d   : > { %3244 = vmatpush1.bf16.msra.mxu0 %v971_v53  ;;  %2516 = vmatprep.subr.bf16.mxu1 %v878_v58  ;;  %v754_v20 = vmax.f32 %v418_v8, 0.0  ;;  %v559_v24 = vmax.f32 %v223_v13, 0.0  ;;  %v561_v25 = vmax.f32 %v225_v14, 0.0  ;;  %v420_v26 = vld [vmem:[%s6698_s0 + $0x708] sm:$0xff]  ;;  %v422_v27 = vld [vmem:[%s6698_s0 + $0x718] sm:$0xff]  ;;  %v879_v29 = vpack.c.bf16 %v557_v6, %v555_v5  ;;  %v229_v32 = vld [vmem:[%s6698_s0 + $0x110] sm:$0xff] }
  0x1e   : > { %3245 = vmatprep.subr.bf16.mxu0 %v974_v1  ;;  %v975_v30 = vpack.c.bf16 %v749_v10, %v747_v9  ;;  %v882_v31 = vpack.c.bf16 %v562_v12, %v560_v11  ;;  %v419_v33 = vld [vmem:[%s6698_s0 + $0x700] sm:$0xff]  ;;  %v421_v34 = vld [vmem:[%s6698_s0 + $0x710] sm:$0xff]  ;;  %v751_v35 = vmax.f32 %v415_v17, 0.0  ;;  %v753_v36 = vmax.f32 %v417_v21, 0.0  ;;  %v232_v39 = vld [vmem:[%s6698_s0 + $0x128] sm:$0xff] }
  0x1f   : > { %v564_v37 = vmax.f32 %v228_v22, 0.0  ;;  %v566_v38 = vmax.f32 %v230_v23, 0.0  ;;  %v234_v40 = vld [vmem:[%s6698_s0 + $0x138] sm:$0xff]  ;;  %v978_v41 = vpack.c.bf16 %v754_v20, %v752_v19  ;;  %v756_v42 = vmax.f32 %v420_v26, 0.0  ;;  %v424_v47 = vld [vmem:[%s6698_s0 + $0x728] sm:$0xff]  ;;  %v231_v53 = vld [vmem:[%s6698_s0 + $0x120] sm:$0xff] }
  0x20   : > { %2517 = vmatpush1.bf16.msra.mxu1 %v877_v4  ;;  %v758_v43 = vmax.f32 %v422_v27, 0.0  ;;  %v881_v44 = vpack.c.bf16 %v561_v25, %v559_v24  ;;  %v563_v45 = vmax.f32 %v227_v28, 0.0  ;;  %v565_v46 = vmax.f32 %v229_v32, 0.0  ;;  %v426_v48 = vld [vmem:[%s6698_s0 + $0x738] sm:$0xff]  ;;  %v233_v54 = vld [vmem:[%s6698_s0 + $0x130] sm:$0xff]  ;;  %v423_v57 = vld [vmem:[%s6698_s0 + $0x720] sm:$0xff] }
  0x21   : > { %3246 = vmatpush1.bf16.msra.mxu0 %v973_v15  ;;  %2518 = vmatprep.subr.bf16.mxu1 %v880_v16  ;;  %v755_v49 = vmax.f32 %v419_v33, 0.0  ;;  %v757_v50 = vmax.f32 %v421_v34, 0.0  ;;  %v568_v51 = vmax.f32 %v232_v39, 0.0  ;;  %v570_v52 = vmax.f32 %v234_v40, 0.0  ;;  %v425_v61 = vld [vmem:[%s6698_s0 + $0x730] sm:$0xff]  ;;  %v236_v62 = vld [vmem:[%s6698_s0 + $0x148] sm:$0xff] }
  0x22   : > { %3247 = vmatprep.subr.bf16.mxu0 %v976_v18  ;;  %v977_v55 = vpack.c.bf16 %v753_v36, %v751_v35  ;;  %v884_v56 = vpack.c.bf16 %v566_v38, %v564_v37  ;;  %v980_v58 = vpack.c.bf16 %v758_v43, %v756_v42  ;;  %v760_v59 = vmax.f32 %v424_v47, 0.0  ;;  %v238_v63 = vld [vmem:[%s6698_s0 + $0x158] sm:$0xff]  ;;  %v428_v2 = vld [vmem:[%s6698_s0 + $0x748] sm:$0xff]  ;;  %v235_v4 = vld [vmem:[%s6698_s0 + $0x140] sm:$0xff] }
  0x23   : > { %v762_v60 = vmax.f32 %v426_v48, 0.0  ;;  %v567_v0 = vmax.f32 %v231_v53, 0.0  ;;  %v569_v1 = vmax.f32 %v233_v54, 0.0  ;;  %v430_v3 = vld [vmem:[%s6698_s0 + $0x758] sm:$0xff]  ;;  %v883_v5 = vpack.c.bf16 %v565_v46, %v563_v45  ;;  %v237_v8 = vld [vmem:[%s6698_s0 + $0x150] sm:$0xff]  ;;  %v427_v9 = vld [vmem:[%s6698_s0 + $0x740] sm:$0xff] }
  0x24   : > { %2519 = vmatpush1.bf16.msra.mxu1 %v879_v29  ;;  %v979_v6 = vpack.c.bf16 %v757_v50, %v755_v49  ;;  %v886_v7 = vpack.c.bf16 %v570_v52, %v568_v51  ;;  %v429_v10 = vld [vmem:[%s6698_s0 + $0x750] sm:$0xff]  ;;  %v759_v11 = vmax.f32 %v423_v57, 0.0  ;;  %v761_v12 = vmax.f32 %v425_v61, 0.0  ;;  %v240_v15 = vld [vmem:[%s6698_s0 + $0x168] sm:$0xff]  ;;  %v242_v16 = vld [vmem:[%s6698_s0 + $0x178] sm:$0xff] }
  0x25   : > { %3248 = vmatpush1.bf16.msra.mxu0 %v975_v30  ;;  %2520 = vmatprep.subr.bf16.mxu1 %v882_v31  ;;  %v572_v13 = vmax.f32 %v236_v62, 0.0  ;;  %v574_v14 = vmax.f32 %v238_v63, 0.0  ;;  %v982_v17 = vpack.c.bf16 %v762_v60, %v760_v59  ;;  %v764_v18 = vmax.f32 %v428_v2, 0.0  ;;  %v432_v23 = vld [vmem:[%s6698_s0 + $0x768] sm:$0xff]  ;;  %v434_v24 = vld [vmem:[%s6698_s0 + $0x778] sm:$0xff]  ;;  %v239_v25 = vld [vmem:[%s6698_s0 + $0x160] sm:$0xff] }
  0x26   : > { %3249 = vmatprep.subr.bf16.mxu0 %v978_v41  ;;  %v766_v19 = vmax.f32 %v430_v3, 0.0  ;;  %v885_v20 = vpack.c.bf16 %v569_v1, %v567_v0  ;;  %v571_v21 = vmax.f32 %v235_v4, 0.0  ;;  %v573_v22 = vmax.f32 %v237_v8, 0.0  ;;  %v241_v30 = vld [vmem:[%s6698_s0 + $0x170] sm:$0xff]  ;;  %v431_v31 = vld [vmem:[%s6698_s0 + $0x760] sm:$0xff]  ;;  %v244_v35 = vld [vmem:[%s6698_s0 + $0x188] sm:$0xff] }
  0x27   : > { %v763_v26 = vmax.f32 %v427_v9, 0.0  ;;  %v765_v27 = vmax.f32 %v429_v10, 0.0  ;;  %v576_v28 = vmax.f32 %v240_v15, 0.0  ;;  %v578_v29 = vmax.f32 %v242_v16, 0.0  ;;  %v433_v34 = vld [vmem:[%s6698_s0 + $0x770] sm:$0xff]  ;;  %v246_v36 = vld [vmem:[%s6698_s0 + $0x198] sm:$0xff] }
  0x28   : > { %2521 = vmatpush1.bf16.msra.mxu1 %v881_v44  ;;  %v981_v32 = vpack.c.bf16 %v761_v12, %v759_v11  ;;  %v888_v33 = vpack.c.bf16 %v574_v14, %v572_v13  ;;  %v984_v37 = vpack.c.bf16 %v766_v19, %v764_v18  ;;  %v768_v38 = vmax.f32 %v432_v23, 0.0  ;;  %v436_v40 = vld [vmem:[%s6698_s0 + $0x788] sm:$0xff]  ;;  %v438_v41 = vld [vmem:[%s6698_s0 + $0x798] sm:$0xff]  ;;  %v243_v42 = vld [vmem:[%s6698_s0 + $0x180] sm:$0xff] }
  0x29   : > { %3250 = vmatpush1.bf16.msra.mxu0 %v977_v55  ;;  %2522 = vmatprep.subr.bf16.mxu1 %v884_v56  ;;  %v770_v39 = vmax.f32 %v434_v24, 0.0  ;;  %v575_v43 = vmax.f32 %v239_v25, 0.0  ;;  %v577_v44 = vmax.f32 %v241_v30, 0.0  ;;  %v245_v45 = vld [vmem:[%s6698_s0 + $0x190] sm:$0xff]  ;;  %v435_v46 = vld [vmem:[%s6698_s0 + $0x780] sm:$0xff]  ;;  %v887_v48 = vpack.c.bf16 %v573_v22, %v571_v21  ;;  %v248_v51 = vld [vmem:[%s6698_s0 + $0x1a8] sm:$0xff] }
  0x2a   : > { %3251 = vmatprep.subr.bf16.mxu0 %v980_v58  ;;  %v437_v47 = vld [vmem:[%s6698_s0 + $0x790] sm:$0xff]  ;;  %v983_v49 = vpack.c.bf16 %v765_v27, %v763_v26  ;;  %v890_v50 = vpack.c.bf16 %v578_v29, %v576_v28  ;;  %v250_v52 = vld [vmem:[%s6698_s0 + $0x1b8] sm:$0xff]  ;;  %v767_v53 = vmax.f32 %v431_v31, 0.0  ;;  %v769_v54 = vmax.f32 %v433_v34, 0.0  ;;  %v440_v60 = vld [vmem:[%s6698_s0 + $0x7a8] sm:$0xff] }
  0x2b   : > { %v580_v55 = vmax.f32 %v244_v35, 0.0  ;;  %v582_v56 = vmax.f32 %v246_v36, 0.0  ;;  %v986_v57 = vpack.c.bf16 %v770_v39, %v768_v38  ;;  %v772_v58 = vmax.f32 %v436_v40, 0.0  ;;  %v4863_v61 = vld [vmem:[%s5586_s8 + $0x4] ss:$44 sps:$4 sm:$0xff]   ;;  %v442_v1 = vld [vmem:[%s6698_s0 + $0x7b8] sm:$0xff] }
  0x2c   : > { %2523 = vmatpush1.bf16.msra.mxu1 %v883_v5  ;;  %v774_v59 = vmax.f32 %v438_v41, 0.0  ;;  %v889_v62 = vpack.c.bf16 %v577_v44, %v575_v43  ;;  %v579_v63 = vmax.f32 %v243_v42, 0.0  ;;  %v581_v0 = vmax.f32 %v245_v45, 0.0  ;;  %v247_v2 = vld [vmem:[%s6698_s0 + $0x1a0] sm:$0xff]  ;;  %v249_v3 = vld [vmem:[%s6698_s0 + $0x1b0] sm:$0xff]  ;;  %2538 = vmatprep.mubr.bf16.mxu1 %v4863_v61  ;;  %v252_v13 = vld [vmem:[%s6698_s0 + $0x1c8] sm:$0xff] }
  0x2d   : > { %3252 = vmatpush1.bf16.msra.mxu0 %v979_v6  ;;  %2524 = vmatprep.subr.bf16.mxu1 %v886_v7  ;;  %v771_v4 = vmax.f32 %v435_v46, 0.0  ;;  %v773_v5 = vmax.f32 %v437_v47, 0.0  ;;  %v584_v6 = vmax.f32 %v248_v51, 0.0  ;;  %v586_v7 = vmax.f32 %v250_v52, 0.0  ;;  %v4866_v8 = vld [vmem:[%s5586_s8 + $0x1c] ss:$44 sps:$4 sm:$0xff]  }
  0x2e   : > { %3253 = vmatprep.subr.bf16.mxu0 %v982_v17  ;;  %v985_v9 = vpack.c.bf16 %v769_v54, %v767_v53  ;;  %v892_v10 = vpack.c.bf16 %v582_v56, %v580_v55  ;;  %v439_v11 = vld [vmem:[%s6698_s0 + $0x7a0] sm:$0xff]  ;;  %v441_v12 = vld [vmem:[%s6698_s0 + $0x7b0] sm:$0xff]  ;;  %v988_v14 = vpack.c.bf16 %v774_v59, %v772_v58  ;;  %v776_v15 = vmax.f32 %v440_v60, 0.0  ;;  %v254_v17 = vld [vmem:[%s6698_s0 + $0x1d8] sm:$0xff]  ;;  %3267 = vmatprep.mubr.bf16.mxu0 %v4866_v8 }
  0x2f   : > { %v778_v16 = vmax.f32 %v442_v1, 0.0  ;;  %v444_v18 = vld [vmem:[%s6698_s0 + $0x7c8] sm:$0xff]  ;;  %v891_v19 = vpack.c.bf16 %v581_v0, %v579_v63  ;;  %v987_v21 = vpack.c.bf16 %v773_v5, %v771_v4  ;;  %v894_v22 = vpack.c.bf16 %v586_v7, %v584_v6  ;;  %v251_v25 = vld [vmem:[%s6698_s0 + $0x1c0] sm:$0xff]  ;;  %v253_v26 = vld [vmem:[%s6698_s0 + $0x1d0] sm:$0xff] }
  0x30   : > { %2525 = vmatpush1.bf16.msra.mxu1 %v885_v20  ;;  %v446_v20 = vld [vmem:[%s6698_s0 + $0x7d8] sm:$0xff]  ;;  %v583_v23 = vmax.f32 %v247_v2, 0.0  ;;  %v585_v24 = vmax.f32 %v249_v3, 0.0  ;;  %v775_v27 = vmax.f32 %v439_v11, 0.0  ;;  %v777_v28 = vmax.f32 %v441_v12, 0.0  ;;  %v443_v31 = vld [vmem:[%s6698_s0 + $0x7c0] sm:$0xff] }
  0x31   : > { %3254 = vmatpush1.bf16.msra.mxu0 %v981_v32  ;;  %2526 = vmatprep.subr.bf16.mxu1 %v888_v33  ;;  %v588_v29 = vmax.f32 %v252_v13, 0.0  ;;  %v590_v30 = vmax.f32 %v254_v17, 0.0  ;;  %v445_v32 = vld [vmem:[%s6698_s0 + $0x7d0] sm:$0xff]  ;;  %v990_v33 = vpack.c.bf16 %v778_v16, %v776_v15  ;;  %v780_v34 = vmax.f32 %v444_v18, 0.0  ;;  %v256_v36 = vld [vmem:[%s6698_s0 + $0x1e8] sm:$0xff]  ;;  %v450_v41 = vld [vmem:[%s6698_s0 + $0x7f8] sm:$0xff] }
  0x32   : > { %3255 = vmatprep.subr.bf16.mxu0 %v984_v37  ;;  %v782_v35 = vmax.f32 %v446_v20, 0.0  ;;  %v258_v37 = vld [vmem:[%s6698_s0 + $0x1f8] sm:$0xff]  ;;  %v587_v38 = vmax.f32 %v251_v25, 0.0  ;;  %v589_v39 = vmax.f32 %v253_v26, 0.0  ;;  %v448_v40 = vld [vmem:[%s6698_s0 + $0x7e8] sm:$0xff]  ;;  %v255_v42 = vld [vmem:[%s6698_s0 + $0x1e0] sm:$0xff]  ;;  %v893_v43 = vpack.c.bf16 %v585_v24, %v583_v23 }
  0x33   : > { %v779_v44 = vmax.f32 %v443_v31, 0.0  ;;  %v781_v45 = vmax.f32 %v445_v32, 0.0  ;;  %v257_v46 = vld [vmem:[%s6698_s0 + $0x1f0] sm:$0xff]  ;;  %v447_v47 = vld [vmem:[%s6698_s0 + $0x7e0] sm:$0xff]  ;;  %v594_v51 = vmax.f32 %v258_v37, 0.0  ;;  %v784_v54 = vmax.f32 %v448_v40, 0.0 }
  0x34   : > { %2527 = vmatpush1.bf16.msra.mxu1 %v887_v48  ;;  %v989_v48 = vpack.c.bf16 %v777_v28, %v775_v27  ;;  %v449_v52 = vld [vmem:[%s6698_s0 + $0x7f0] sm:$0xff]  ;;  %v992_v53 = vpack.c.bf16 %v782_v35, %v780_v34  ;;  %v786_v55 = vmax.f32 %v450_v41, 0.0  ;;  %v260_v56 = vld [vmem:[%s6698_s0 + $0x208] sm:$0xff]  ;;  %v895_v58 = vpack.c.bf16 %v589_v39, %v587_v38  ;;  %v454_v60 = vld [vmem:[%s6698_s0 + $0x818] sm:$0xff] }
  0x35   : > { %3256 = vmatpush1.bf16.msra.mxu0 %v983_v49  ;;  %2528 = vmatprep.subr.bf16.mxu1 %v890_v50  ;;  %v896_v49 = vpack.c.bf16 %v590_v30, %v588_v29  ;;  %v592_v50 = vmax.f32 %v256_v36, 0.0  ;;  %v452_v59 = vld [vmem:[%s6698_s0 + $0x808] sm:$0xff]  ;;  %v991_v61 = vpack.c.bf16 %v781_v45, %v779_v44  ;;  %v593_v63 = vmax.f32 %v257_v46, 0.0  ;;  %v259_v1 = vld [vmem:[%s6698_s0 + $0x200] sm:$0xff]  ;;  %v261_v2 = vld [vmem:[%s6698_s0 + $0x210] sm:$0xff] }
  0x36   : > { %3257 = vmatprep.subr.bf16.mxu0 %v986_v57  ;;  %v262_v57 = vld [vmem:[%s6698_s0 + $0x218] sm:$0xff]  ;;  %v783_v0 = vmax.f32 %v447_v47, 0.0  ;;  %v451_v3 = vld [vmem:[%s6698_s0 + $0x800] sm:$0xff]  ;;  %v785_v5 = vmax.f32 %v449_v52, 0.0  ;;  %v596_v6 = vmax.f32 %v260_v56, 0.0  ;;  %v453_v8 = vld [vmem:[%s6698_s0 + $0x810] sm:$0xff]  ;;  %v994_v11 = vpack.c.bf16 %v786_v55, %v784_v54 }
  0x37   : > { %v898_v4 = vpack.c.bf16 %v594_v51, %v592_v50  ;;  %v598_v7 = vmax.f32 %v262_v57, 0.0  ;;  %v788_v12 = vmax.f32 %v452_v59, 0.0  ;;  %v790_v13 = vmax.f32 %v454_v60, 0.0  ;;  %v458_v15 = vld [vmem:[%s6698_s0 + $0x838] sm:$0xff]  ;;  %v263_v16 = vld [vmem:[%s6698_s0 + $0x220] sm:$0xff]  ;;  %v265_v20 = vld [vmem:[%s6698_s0 + $0x230] sm:$0xff] }
  0x38   : > { %2529 = vmatpush1.bf16.msra.mxu1 %v889_v62  ;;  %v591_v62 = vmax.f32 %v255_v42, 0.0  ;;  %v595_v18 = vmax.f32 %v259_v1, 0.0  ;;  %v4861_v23 = vld [vmem:[%s5586_s8] ss:$44 sps:$4 sm:$0xff]   ;;  %v787_v25 = vmax.f32 %v451_v3, 0.0  ;;  %v789_v26 = vmax.f32 %v453_v8, 0.0 }
  0x39   : > { %3258 = vmatpush1.bf16.msra.mxu0 %v985_v9  ;;  %2530 = vmatprep.subr.bf16.mxu1 %v892_v10  ;;  %v264_v9 = vld [vmem:[%s6698_s0 + $0x228] sm:$0xff]  ;;  %v266_v10 = vld [vmem:[%s6698_s0 + $0x238] sm:$0xff]  ;;  %v900_v24 = vpack.c.bf16 %v598_v7, %v596_v6  ;;  %v457_v27 = vld [vmem:[%s6698_s0 + $0x830] sm:$0xff]  ;;  %v996_v29 = vpack.c.bf16 %v790_v13, %v788_v12  ;;  %v794_v36 = vmax.f32 %v458_v15, 0.0  ;;  %v599_v41 = vmax.f32 %v263_v16, 0.0 }
  0x3a   : > { %3259 = vmatprep.subr.bf16.mxu0 %v988_v14  ;;  %v456_v14 = vld [vmem:[%s6698_s0 + $0x828] sm:$0xff]  ;;  %v897_v17 = vpack.c.bf16 %v593_v63, %v591_v62  ;;  %v4864_v28 = vld [vmem:[%s5586_s8 + $0x18] ss:$44 sps:$4 sm:$0xff]   ;;  %v600_v30 = vmax.f32 %v264_v9, 0.0  ;;  %v602_v31 = vmax.f32 %v266_v10, 0.0  ;;  %v601_v42 = vmax.f32 %v265_v20, 0.0 }
  0x3b   : > { %v268_v32 = vld [vmem:[%s6698_s0 + $0x248] sm:$0xff]  ;;  %v792_v35 = vmax.f32 %v456_v14, 0.0  ;;  %v462_v38 = vld [vmem:[%s6698_s0 + $0x858] sm:$0xff]  ;;  %v4869_v40 = vld [vmem:[%s5586_s8 + $0x74] ss:$44 sps:$4 sm:$0xff]   ;;  %v995_v45 = vpack.c.bf16 %v789_v26, %v787_v25  ;;  %v793_v46 = vmax.f32 %v457_v27, 0.0 }
  0x3c   : > { %2531 = vmatpush1.bf16.msra.mxu1 %v891_v19  ;;  %v597_v19 = vmax.f32 %v261_v2, 0.0  ;;  %v4867_v34 = vld [vmem:[%s5586_s8 + $0x5c] ss:$44 sps:$4 sm:$0xff]   ;;  %v267_v44 = vld [vmem:[%s6698_s0 + $0x240] sm:$0xff]  ;;  %v604_v47 = vmax.f32 %v268_v32, 0.0  ;;  %v461_v51 = vld [vmem:[%s6698_s0 + $0x850] sm:$0xff]  ;;  %v902_v52 = vpack.c.bf16 %v602_v31, %v600_v30 }
  0x3d   : > { %3260 = vmatpush1.bf16.msra.mxu0 %v987_v21  ;;  %2532 = vmatprep.subr.bf16.mxu1 %v894_v22  ;;  %v455_v21 = vld [vmem:[%s6698_s0 + $0x820] sm:$0xff]  ;;  %v993_v22 = vpack.c.bf16 %v785_v5, %v783_v0  ;;  %v460_v37 = vld [vmem:[%s6698_s0 + $0x848] sm:$0xff]  ;;  %v798_v54 = vmax.f32 %v462_v38, 0.0  ;;  %v998_v55 = vpack.c.bf16 %v794_v36, %v792_v35  ;;  %v274_v57 = vld [vmem:[%s6698_s0 + $0x278] sm:$0xff]  ;;  %v603_v59 = vmax.f32 %v267_v44, 0.0 }
  0x3e   : > { %3261 = vmatprep.subr.bf16.mxu0 %v990_v33  ;;  %v270_v33 = vld [vmem:[%s6698_s0 + $0x258] sm:$0xff]  ;;  %v899_v39 = vpack.c.bf16 %v597_v19, %v595_v18  ;;  %v459_v50 = vld [vmem:[%s6698_s0 + $0x840] sm:$0xff]  ;;  %v272_v56 = vld [vmem:[%s6698_s0 + $0x268] sm:$0xff]  ;;  %v797_v3 = vmax.f32 %v461_v51, 0.0 }
  0x3f   : > { %v466_v62 = vld [vmem:[%s6698_s0 + $0x878] sm:$0xff]  ;;  %v795_v2 = vmax.f32 %v459_v50, 0.0  ;;  %v273_v5 = vld [vmem:[%s6698_s0 + $0x270] sm:$0xff]  ;;  %v463_v6 = vld [vmem:[%s6698_s0 + $0x860] sm:$0xff]  ;;  %v608_v10 = vmax.f32 %v272_v56, 0.0 }
  0x40   : > { %2533 = vmatpush1.bf16.msra.mxu1 %v893_v43  ;;  %v791_v43 = vmax.f32 %v455_v21, 0.0  ;;  %v4871_v63 = vld [vmem:[%s5586_s8 + $0x58] ss:$44 sps:$4 sm:$0xff]   ;;  %v4872_v7 = vld [vmem:[%s5586_s8 + $0x70] ss:$44 sps:$4 sm:$0xff]   ;;  %v276_v13 = vld [vmem:[%s6698_s0 + $0x288] sm:$0xff] }
  0x41   : > { %3262 = vmatpush1.bf16.msra.mxu0 %v989_v48  ;;  %2534 = vmatprep.subr.bf16.mxu1 %v896_v49  ;;  %v606_v48 = vmax.f32 %v270_v33, 0.0  ;;  %v269_v49 = vld [vmem:[%s6698_s0 + $0x250] sm:$0xff]  ;;  %v278_v14 = vld [vmem:[%s6698_s0 + $0x298] sm:$0xff]  ;;  %v468_v18 = vld [vmem:[%s6698_s0 + $0x888] sm:$0xff]  ;;  %v999_v21 = vpack.c.bf16 %v797_v3, %v795_v2  ;;  %v612_v30 = vmax.f32 %v276_v13, 0.0 }
  0x42   : > { %3263 = vmatprep.subr.bf16.mxu0 %v992_v53  ;;  %v796_v53 = vmax.f32 %v460_v37, 0.0  ;;  %v605_v60 = vmax.f32 %v269_v49, 0.0  ;;  %v997_v0 = vpack.c.bf16 %v793_v46, %v791_v43  ;;  %v4873_v8 = vld [vmem:[%s5586_s8 + $0xb4] ss:$44 sps:$4 sm:$0xff]   ;;  %v4875_v15 = vld [vmem:[%s5586_s8 + $0xcc] ss:$44 sps:$4 sm:$0xff]  }
  0x43   : > { %v904_v1 = vpack.c.bf16 %v606_v48, %v604_v47  ;;  %v465_v12 = vld [vmem:[%s6698_s0 + $0x870] sm:$0xff]  ;;  %v470_v20 = vld [vmem:[%s6698_s0 + $0x898] sm:$0xff]  ;;  %v275_v25 = vld [vmem:[%s6698_s0 + $0x280] sm:$0xff]  ;;  %v614_v31 = vmax.f32 %v278_v14, 0.0  ;;  %v804_v36 = vmax.f32 %v468_v18, 0.0 }
  0x44   : > { %2535 = vmatpush1.bf16.msra.mxu1 %v895_v58  ;;  %v901_v58 = vpack.c.bf16 %v601_v42, %v599_v41  ;;  %v1000_v9 = vpack.c.bf16 %v798_v54, %v796_v53  ;;  %v903_v19 = vpack.c.bf16 %v605_v60, %v603_v59  ;;  %v277_v26 = vld [vmem:[%s6698_s0 + $0x290] sm:$0xff]  ;;  %v467_v27 = vld [vmem:[%s6698_s0 + $0x880] sm:$0xff]  ;;  %v280_v33 = vld [vmem:[%s6698_s0 + $0x2a8] sm:$0xff]  ;;  %v806_v37 = vmax.f32 %v470_v20, 0.0 }
  0x45   : > { %3264 = vmatpush1.bf16.msra.mxu0 %v991_v61  ;;  %2536 = vmatprep.subr.bf16.mxu1 %v898_v4  ;;  %v464_v61 = vld [vmem:[%s6698_s0 + $0x868] sm:$0xff]  ;;  %v271_v4 = vld [vmem:[%s6698_s0 + $0x260] sm:$0xff]  ;;  %v469_v32 = vld [vmem:[%s6698_s0 + $0x890] sm:$0xff]  ;;  %v611_v38 = vmax.f32 %v275_v25, 0.0  ;;  %v616_v46 = vmax.f32 %v280_v33, 0.0  ;;  %v908_v51 = vpack.c.bf16 %v614_v31, %v612_v30 }
  0x46   : > { %3265 = vmatprep.subr.bf16.mxu0 %v994_v11  ;;  %v610_v11 = vmax.f32 %v274_v57, 0.0  ;;  %v800_v16 = vmax.f32 %v464_v61, 0.0  ;;  %v472_v41 = vld [vmem:[%s6698_s0 + $0x8a8] sm:$0xff]  ;;  %v474_v42 = vld [vmem:[%s6698_s0 + $0x8b8] sm:$0xff]  ;;  %v279_v48 = vld [vmem:[%s6698_s0 + $0x2a0] sm:$0xff]  ;;  %v1004_v54 = vpack.c.bf16 %v806_v37, %v804_v36 }
  0x47   : > { %v4877_v43 = vld [vmem:[%s5586_s8 + $0xb0] ss:$44 sps:$4 sm:$0xff]   ;;  %v4878_v49 = vld [vmem:[%s5586_s8 + $0xc8] ss:$44 sps:$4 sm:$0xff]   ;;  %v471_v53 = vld [vmem:[%s6698_s0 + $0x8a0] sm:$0xff]  ;;  %v810_v56 = vmax.f32 %v474_v42, 0.0 }
  0x48   : > { %2537 = vmatpush1.bf16.msra.mxu1 %v897_v17  ;;  %v802_v17 = vmax.f32 %v466_v62, 0.0  ;;  %v473_v57 = vld [vmem:[%s6698_s0 + $0x8b0] sm:$0xff]  ;;  %v284_v60 = vld [vmem:[%s6698_s0 + $0x2c8] sm:$0xff]  ;;  %v286_v61 = vld [vmem:[%s6698_s0 + $0x2d8] sm:$0xff]  ;;  %v807_v3 = vmax.f32 %v471_v53, 0.0 }
  0x49   : > { %3266 = vmatpush1.bf16.msra.mxu0 %v993_v22  ;;  %2749 = vmatprep.subr.bf16.mxu1 %v900_v24  ;;  %v607_v22 = vmax.f32 %v271_v4, 0.0  ;;  %v799_v24 = vmax.f32 %v463_v6, 0.0  ;;  %v4881_v62 = vld [vmem:[%s5586_s8 + $0x124] ss:$44 sps:$4 sm:$0xff]   ;;  %v809_v4 = vmax.f32 %v473_v57, 0.0  ;;  %v622_v6 = vmax.f32 %v286_v61, 0.0 }
  0x4a   : > { %3478 = vmatprep.subr.bf16.mxu0 %v996_v29  ;;  %v801_v29 = vmax.f32 %v465_v12, 0.0  ;;  %v1002_v35 = vpack.c.bf16 %v802_v17, %v800_v16  ;;  %v283_v12 = vld [vmem:[%s6698_s0 + $0x2c0] sm:$0xff]  ;;  %v285_v13 = vld [vmem:[%s6698_s0 + $0x2d0] sm:$0xff]  ;;  %v480_v33 = vld [vmem:[%s6698_s0 + $0x8e8] sm:$0xff] }
  0x4b   : > { %2539 = vmatmul.mubr.bf16.vlgmr.msra.gmra.mrb[0].mxu1 %v4861_v23  ;;  %v609_v23 = vmax.f32 %v273_v5, 0.0  ;;  %v620_v5 = vmax.f32 %v284_v60, 0.0  ;;  %v619_v14 = vmax.f32 %v283_v12, 0.0  ;;  %v475_v16 = vld [vmem:[%s6698_s0 + $0x8c0] sm:$0xff]  ;;  %v477_v17 = vld [vmem:[%s6698_s0 + $0x8d0] sm:$0xff]  ;;  %v816_v37 = vmax.f32 %v480_v33, 0.0 }
  0x4c   : > { %3268 = vmatmul.mubr.bf16.vlgmr.msra.gmra.mrb[0].mxu0 %v4864_v28  ;;  %2750 = vmatpush1.bf16.msra.mxu1 %v899_v39  ;;  %v906_v28 = vpack.c.bf16 %v610_v11, %v608_v10  ;;  %v613_v39 = vmax.f32 %v277_v26, 0.0  ;;  %v1001_v50 = vpack.c.bf16 %v801_v29, %v799_v24  ;;  %v4883_v18 = vld [vmem:[%s5586_s8 + $0x108] ss:$44 sps:$4 sm:$0xff]   ;;  %v811_v20 = vmax.f32 %v475_v16, 0.0  ;;  %v290_v29 = vld [vmem:[%s6698_s0 + $0x2f8] sm:$0xff]  ;;  %v291_v60 = vld [vmem:[%s6698_s0 + $0x300] sm:$0xff] }
  0x4d   : > { %3479 = vmatpush1.bf16.msra.mxu0 %v995_v45  ;;  %2548 = vmatprep.mubr.bf16.mxu1 %v4867_v34  ;;  %v282_v34 = vld [vmem:[%s6698_s0 + $0x2b8] sm:$0xff]  ;;  %v905_v44 = vpack.c.bf16 %v609_v23, %v607_v22  ;;  %v805_v45 = vmax.f32 %v469_v32, 0.0  ;;  %v4884_v22 = vld [vmem:[%s5586_s8 + $0x120] ss:$44 sps:$4 sm:$0xff]   ;;  %v4885_v23 = vld [vmem:[%s5586_s8 + $0x164] ss:$44 sps:$4 sm:$0xff]   ;;  %v1005_v24 = vpack.c.bf16 %v809_v4, %v807_v3  ;;  %v912_v25 = vpack.c.bf16 %v622_v6, %v620_v5 }
  0x4e   : > { %3277 = vmatprep.mubr.bf16.mxu0 %v4869_v40  ;;  %2751 = vmatprep.subr.bf16.mxu1 %v902_v52  ;;  %v803_v40 = vmax.f32 %v467_v27, 0.0  ;;  %v618_v47 = vmax.f32 %v282_v34, 0.0  ;;  %v281_v52 = vld [vmem:[%s6698_s0 + $0x2b0] sm:$0xff]  ;;  %v907_v59 = vpack.c.bf16 %v613_v39, %v611_v38  ;;  %v4887_v26 = vld [vmem:[%s5586_s8 + $0x17c] ss:$44 sps:$4 sm:$0xff]   ;;  %v626_v32 = vmax.f32 %v290_v29, 0.0 }
  0x4f   : > { %3480 = vmatprep.subr.bf16.mxu0 %v998_v55  ;;  %v808_v55 = vmax.f32 %v472_v41, 0.0  ;;  %v617_v2 = vmax.f32 %v281_v52, 0.0  ;;  %v482_v34 = vld [vmem:[%s6698_s0 + $0x8f8] sm:$0xff]  ;;  %v289_v39 = vld [vmem:[%s6698_s0 + $0x2f0] sm:$0xff]  ;;  %v479_v41 = vld [vmem:[%s6698_s0 + $0x8e0] sm:$0xff] }
  0x50   : > { %2752 = vmatpush1.bf16.msra.mxu1 %v901_v58  ;;  %v4879_v58 = vld [vmem:[%s5586_s8 + $0x10c] ss:$44 sps:$4 sm:$0xff]   ;;  %v818_v38 = vmax.f32 %v482_v34, 0.0  ;;  %v481_v42 = vld [vmem:[%s6698_s0 + $0x8f0] sm:$0xff]  ;;  %v4891_v3 = vld [vmem:[%s5586_s8 + $0x1bc] ss:$44 sps:$4 sm:$0xff]  }
  0x51   : > { %3481 = vmatpush1.bf16.msra.mxu0 %v997_v0  ;;  %2753 = vmatprep.subr.bf16.mxu1 %v904_v1  ;;  %v910_v0 = vpack.c.bf16 %v618_v47, %v616_v46  ;;  %v615_v1 = vmax.f32 %v279_v48, 0.0  ;;  %v817_v46 = vmax.f32 %v481_v42, 0.0  ;;  %v292_v48 = vld [vmem:[%s6698_s0 + $0x308] sm:$0xff]  ;;  %v293_v61 = vld [vmem:[%s6698_s0 + $0x310] sm:$0xff]  ;;  %v490_v16 = vld [vmem:[%s6698_s0 + $0x938] sm:$0xff] }
  0x52   : > { %3482 = vmatprep.subr.bf16.mxu0 %v1000_v9  ;;  %v1006_v9 = vpack.c.bf16 %v810_v56, %v808_v55  ;;  %v1010_v47 = vpack.c.bf16 %v818_v38, %v816_v37  ;;  %v628_v52 = vmax.f32 %v292_v48, 0.0  ;;  %v484_v53 = vld [vmem:[%s6698_s0 + $0x908] sm:$0xff]  ;;  %v4890_v55 = vld [vmem:[%s5586_s8 + $0x178] ss:$44 sps:$4 sm:$0xff]   ;;  %v301_v42 = vld [vmem:[%s6698_s0 + $0x350] sm:$0xff] }
  0x53   : > { %2549 = vmatmul.mubr.bf16.gmra.mrb[4].mxu1 %v4871_v63  ;;  %v1003_v63 = vpack.c.bf16 %v805_v45, %v803_v40  ;;  %v815_v45 = vmax.f32 %v479_v41, 0.0  ;;  %v300_v34 = vld [vmem:[%s6698_s0 + $0x348] sm:$0xff]  ;;  %v299_v41 = vld [vmem:[%s6698_s0 + $0x340] sm:$0xff]  ;;  %v4901_v48 = vld [vmem:[%s5586_s8 + $0x210] ss:$44 sps:$4 sm:$0xff]  }
  0x54   : > { %3278 = vmatmul.mubr.bf16.gmra.mrb[4].mxu0 %v4872_v7  ;;  %2558 = vmatprep.mubr.bf16.mxu1 %v4873_v8  ;;  %v476_v7 = vld [vmem:[%s6698_s0 + $0x8c8] sm:$0xff]  ;;  %v478_v8 = vld [vmem:[%s6698_s0 + $0x8d8] sm:$0xff]  ;;  %v636_v37 = vmax.f32 %v300_v34, 0.0 }
  0x55   : > { %3287 = vmatprep.mubr.bf16.mxu0 %v4875_v15  ;;  %2754 = vmatpush1.bf16.msra.mxu1 %v903_v19  ;;  %v812_v10 = vmax.f32 %v476_v7, 0.0  ;;  %v814_v11 = vmax.f32 %v478_v8, 0.0  ;;  %v621_v15 = vmax.f32 %v285_v13, 0.0  ;;  %v909_v19 = vpack.c.bf16 %v617_v2, %v615_v1  ;;  %v485_v1 = vld [vmem:[%s6698_s0 + $0x910] sm:$0xff] }
  0x56   : > { %3483 = vmatpush1.bf16.msra.mxu0 %v999_v21  ;;  %2755 = vmatprep.subr.bf16.mxu1 %v906_v28  ;;  %v813_v21 = vmax.f32 %v477_v17, 0.0  ;;  %v288_v28 = vld [vmem:[%s6698_s0 + $0x2e8] sm:$0xff]  ;;  %v1009_v56 = vpack.c.bf16 %v817_v46, %v815_v45  ;;  %v821_v6 = vmax.f32 %v485_v1, 0.0  ;;  %v4893_v7 = vld [vmem:[%s5586_s8 + $0x1d4] ss:$44 sps:$4 sm:$0xff]   ;;  %v637_v45 = vmax.f32 %v301_v42, 0.0 }
  0x57   : > { %3484 = vmatprep.subr.bf16.mxu0 %v1002_v35  ;;  %v1008_v27 = vpack.c.bf16 %v814_v11, %v812_v10  ;;  %v911_v30 = vpack.c.bf16 %v621_v15, %v619_v14  ;;  %v624_v31 = vmax.f32 %v288_v28, 0.0  ;;  %v287_v35 = vld [vmem:[%s6698_s0 + $0x2e0] sm:$0xff]  ;;  %v296_v10 = vld [vmem:[%s6698_s0 + $0x328] sm:$0xff]  ;;  %v298_v11 = vld [vmem:[%s6698_s0 + $0x338] sm:$0xff] }
  0x58   : > { %v1007_v36 = vpack.c.bf16 %v813_v21, %v811_v20  ;;  %v623_v40 = vmax.f32 %v287_v35, 0.0  ;;  %v632_v12 = vmax.f32 %v296_v10, 0.0  ;;  %v634_v13 = vmax.f32 %v298_v11, 0.0  ;;  %v488_v14 = vld [vmem:[%s6698_s0 + $0x928] sm:$0xff]  ;;  %v4895_v15 = vld [vmem:[%s5586_s8 + $0x1b8] ss:$44 sps:$4 sm:$0xff]  }
  0x59   : > { %2756 = vmatpush1.bf16.msra.mxu1 %v905_v44  ;;  %v625_v44 = vmax.f32 %v289_v39, 0.0  ;;  %v824_v17 = vmax.f32 %v488_v14, 0.0  ;;  %v826_v21 = vmax.f32 %v490_v16, 0.0  ;;  %v4897_v28 = vld [vmem:[%s5586_s8 + $0x214] ss:$44 sps:$4 sm:$0xff]   ;;  %v302_v35 = vld [vmem:[%s6698_s0 + $0x358] sm:$0xff] }
  0x5a   : > { %3485 = vmatpush1.bf16.msra.mxu0 %v1001_v50  ;;  %2757 = vmatprep.subr.bf16.mxu1 %v908_v51  ;;  %v294_v51 = vld [vmem:[%s6698_s0 + $0x318] sm:$0xff]  ;;  %v918_v20 = vpack.c.bf16 %v634_v13, %v632_v12  ;;  %v638_v38 = vmax.f32 %v302_v35, 0.0  ;;  %v491_v46 = vld [vmem:[%s6698_s0 + $0x940] sm:$0xff]  ;;  %v308_v14 = vld [vmem:[%s6698_s0 + $0x388] sm:$0xff] }
  0x5b   : > { %2559 = vmatmul.mubr.bf16.gmra.mrb[8].mxu1 %v4877_v43  ;;  %3486 = vmatprep.subr.bf16.mxu0 %v1004_v54  ;;  %v914_v43 = vpack.c.bf16 %v626_v32, %v624_v31  ;;  %v913_v50 = vpack.c.bf16 %v625_v44, %v623_v40  ;;  %v486_v54 = vld [vmem:[%s6698_s0 + $0x918] sm:$0xff]  ;;  %v630_v57 = vmax.f32 %v294_v51, 0.0  ;;  %v1014_v29 = vpack.c.bf16 %v826_v21, %v824_v17  ;;  %v504_v42 = vld [vmem:[%s6698_s0 + $0x9a8] sm:$0xff] }
  0x5c   : > { %3288 = vmatmul.mubr.bf16.gmra.mrb[8].mxu0 %v4878_v49  ;;  %2568 = vmatprep.mubr.bf16.mxu1 %v4879_v58  ;;  %v4889_v49 = vld [vmem:[%s5586_s8 + $0x160] ss:$44 sps:$4 sm:$0xff]   ;;  %v820_v58 = vmax.f32 %v484_v53, 0.0  ;;  %v494_v39 = vld [vmem:[%s6698_s0 + $0x958] sm:$0xff]  ;;  %v635_v44 = vmax.f32 %v299_v41, 0.0  ;;  %v644_v17 = vmax.f32 %v308_v14, 0.0 }
  0x5d   : > { %3297 = vmatprep.mubr.bf16.mxu0 %v4881_v62  ;;  %2758 = vmatpush1.bf16.msra.mxu1 %v907_v59  ;;  %v822_v59 = vmax.f32 %v486_v54, 0.0  ;;  %v483_v62 = vld [vmem:[%s6698_s0 + $0x900] sm:$0xff]  ;;  %v916_v4 = vpack.c.bf16 %v630_v57, %v628_v52  ;;  %v4899_v31 = vld [vmem:[%s5586_s8 + $0x22c] ss:$44 sps:$4 sm:$0xff]   ;;  %v4902_v52 = vld [vmem:[%s5586_s8 + $0x228] ss:$44 sps:$4 sm:$0xff]  }
  0x5e   : > { %3487 = vmatpush1.bf16.msra.mxu0 %v1003_v63  ;;  %2759 = vmatprep.subr.bf16.mxu1 %v910_v0  ;;  %v627_v63 = vmax.f32 %v291_v60, 0.0  ;;  %v629_v0 = vmax.f32 %v293_v61, 0.0  ;;  %v819_v2 = vmax.f32 %v483_v62, 0.0  ;;  %v4903_v53 = vld [vmem:[%s5586_s8 + $0x26c] ss:$44 sps:$4 sm:$0xff]  }
  0x5f   : > { %3488 = vmatprep.subr.bf16.mxu0 %v1006_v9  ;;  %v1012_v5 = vpack.c.bf16 %v822_v59, %v820_v58  ;;  %v304_v58 = vld [vmem:[%s6698_s0 + $0x368] sm:$0xff]  ;;  %v306_v59 = vld [vmem:[%s6698_s0 + $0x378] sm:$0xff] }
  0x60   : > { %v915_v8 = vpack.c.bf16 %v629_v0, %v627_v63  ;;  %v1011_v9 = vpack.c.bf16 %v821_v6, %v819_v2  ;;  %v640_v60 = vmax.f32 %v304_v58, 0.0  ;;  %v642_v61 = vmax.f32 %v306_v59, 0.0  ;;  %v496_v62 = vld [vmem:[%s6698_s0 + $0x968] sm:$0xff]  ;;  %v498_v63 = vld [vmem:[%s6698_s0 + $0x978] sm:$0xff]  ;;  %v303_v0 = vld [vmem:[%s6698_s0 + $0x360] sm:$0xff] }
  0x61   : > { %2760 = vmatpush1.bf16.msra.mxu1 %v909_v19  ;;  %v4896_v19 = vld [vmem:[%s5586_s8 + $0x1d0] ss:$44 sps:$4 sm:$0xff]   ;;  %v832_v1 = vmax.f32 %v496_v62, 0.0  ;;  %v834_v2 = vmax.f32 %v498_v63, 0.0  ;;  %v4917_v59 = vld [vmem:[%s5586_s8 + $0x334] ss:$44 sps:$4 sm:$0xff]  }
  0x62   : > { %3489 = vmatpush1.bf16.msra.mxu0 %v1005_v24  ;;  %2761 = vmatprep.subr.bf16.mxu1 %v912_v25  ;;  %v487_v24 = vld [vmem:[%s6698_s0 + $0x920] sm:$0xff]  ;;  %v497_v6 = vld [vmem:[%s6698_s0 + $0x970] sm:$0xff]  ;;  %v310_v16 = vld [vmem:[%s6698_s0 + $0x398] sm:$0xff] }
  0x63   : > { %2569 = vmatmul.mubr.bf16.gmra.mrb[12].mxu1 %v4883_v18  ;;  %3490 = vmatprep.subr.bf16.mxu0 %v1008_v27  ;;  %v295_v18 = vld [vmem:[%s6698_s0 + $0x320] sm:$0xff]  ;;  %v823_v27 = vmax.f32 %v487_v24, 0.0  ;;  %v833_v10 = vmax.f32 %v497_v6, 0.0  ;;  %v1018_v11 = vpack.c.bf16 %v834_v2, %v832_v1  ;;  %v316_v62 = vld [vmem:[%s6698_s0 + $0x3c8] sm:$0xff]  ;;  %v318_v63 = vld [vmem:[%s6698_s0 + $0x3d8] sm:$0xff] }
  0x64   : > { %3298 = vmatmul.mubr.bf16.gmra.mrb[12].mxu0 %v4884_v22  ;;  %2578 = vmatprep.mubr.bf16.mxu1 %v4885_v23  ;;  %v297_v22 = vld [vmem:[%s6698_s0 + $0x330] sm:$0xff]  ;;  %v631_v23 = vmax.f32 %v295_v18, 0.0  ;;  %v500_v18 = vld [vmem:[%s6698_s0 + $0x988] sm:$0xff]  ;;  %v652_v1 = vmax.f32 %v316_v62, 0.0  ;;  %v654_v2 = vmax.f32 %v318_v63, 0.0 }
  0x65   : > { %3307 = vmatprep.mubr.bf16.mxu0 %v4887_v26  ;;  %2762 = vmatpush1.bf16.msra.mxu1 %v911_v30  ;;  %v633_v25 = vmax.f32 %v297_v22, 0.0  ;;  %v489_v26 = vld [vmem:[%s6698_s0 + $0x930] sm:$0xff]  ;;  %v836_v21 = vmax.f32 %v500_v18, 0.0  ;;  %v4908_v24 = vld [vmem:[%s5586_s8 + $0x280] ss:$44 sps:$4 sm:$0xff]  }
  0x66   : > { %3491 = vmatpush1.bf16.msra.mxu0 %v1007_v36  ;;  %2763 = vmatprep.subr.bf16.mxu1 %v914_v43  ;;  %v825_v30 = vmax.f32 %v489_v26, 0.0  ;;  %v492_v36 = vld [vmem:[%s6698_s0 + $0x948] sm:$0xff]  ;;  %v830_v43 = vmax.f32 %v494_v39, 0.0  ;;  %v317_v6 = vld [vmem:[%s6698_s0 + $0x3d0] sm:$0xff] }
  0x67   : > { %3492 = vmatprep.subr.bf16.mxu0 %v1010_v47  ;;  %v917_v32 = vpack.c.bf16 %v633_v25, %v631_v23  ;;  %v828_v40 = vmax.f32 %v492_v36, 0.0  ;;  %v493_v47 = vld [vmem:[%s6698_s0 + $0x950] sm:$0xff]  ;;  %v307_v23 = vld [vmem:[%s6698_s0 + $0x380] sm:$0xff]  ;;  %v4939_v62 = vld [vmem:[%s5586_s8 + $0x47c] ss:$44 sps:$4 sm:$0xff]  }
  0x68   : > { %v1013_v33 = vpack.c.bf16 %v825_v30, %v823_v27  ;;  %v829_v51 = vmax.f32 %v493_v47, 0.0  ;;  %v309_v25 = vld [vmem:[%s6698_s0 + $0x390] sm:$0xff]  ;;  %v643_v26 = vmax.f32 %v307_v23, 0.0  ;;  %v4913_v39 = vld [vmem:[%s5586_s8 + $0x2c0] ss:$44 sps:$4 sm:$0xff]  }
  0x69   : > { %2764 = vmatpush1.bf16.msra.mxu1 %v913_v50  ;;  %v827_v50 = vmax.f32 %v491_v46, 0.0  ;;  %v1016_v54 = vpack.c.bf16 %v830_v43, %v828_v40  ;;  %v4909_v27 = vld [vmem:[%s5586_s8 + $0x2c4] ss:$44 sps:$4 sm:$0xff]   ;;  %v645_v30 = vmax.f32 %v309_v25, 0.0  ;;  %v314_v40 = vld [vmem:[%s6698_s0 + $0x3b8] sm:$0xff]  ;;  %v840_v46 = vmax.f32 %v504_v42, 0.0 }
  0x6a   : > { %3493 = vmatpush1.bf16.msra.mxu0 %v1009_v56  ;;  %2765 = vmatprep.subr.bf16.mxu1 %v916_v4  ;;  %v4905_v56 = vld [vmem:[%s5586_s8 + $0x284] ss:$44 sps:$4 sm:$0xff]   ;;  %v639_v4 = vmax.f32 %v303_v0, 0.0  ;;  %v506_v43 = vld [vmem:[%s6698_s0 + $0x9b8] sm:$0xff]  ;;  %v508_v0 = vld [vmem:[%s6698_s0 + $0x9c8] sm:$0xff] }
  0x6b   : > { %2579 = vmatmul.mubr.bf16.gmra.mrb[16].mxu1 %v4889_v49  ;;  %3494 = vmatprep.subr.bf16.mxu0 %v1012_v5  ;;  %v920_v49 = vpack.c.bf16 %v638_v38, %v636_v37  ;;  %v1015_v57 = vpack.c.bf16 %v829_v51, %v827_v50  ;;  %v495_v5 = vld [vmem:[%s6698_s0 + $0x960] sm:$0xff]  ;;  %v923_v35 = vpack.c.bf16 %v645_v30, %v643_v26  ;;  %v312_v38 = vld [vmem:[%s6698_s0 + $0x3a8] sm:$0xff]  ;;  %v842_v47 = vmax.f32 %v506_v43, 0.0  ;;  %v514_v26 = vld [vmem:[%s6698_s0 + $0x9f8] sm:$0xff] }
  0x6c   : > { %3308 = vmatmul.mubr.bf16.gmra.mrb[16].mxu0 %v4890_v55  ;;  %2588 = vmatprep.mubr.bf16.mxu1 %v4891_v3  ;;  %v919_v55 = vpack.c.bf16 %v637_v45, %v635_v44  ;;  %v305_v3 = vld [vmem:[%s6698_s0 + $0x370] sm:$0xff]  ;;  %v648_v41 = vmax.f32 %v312_v38, 0.0  ;;  %v4914_v44 = vld [vmem:[%s5586_s8 + $0x2d8] ss:$44 sps:$4 sm:$0xff]   ;;  %v650_v45 = vmax.f32 %v314_v40, 0.0  ;;  %v512_v25 = vld [vmem:[%s6698_s0 + $0x9e8] sm:$0xff] }
  0x6d   : > { %3317 = vmatprep.mubr.bf16.mxu0 %v4893_v7  ;;  %2766 = vmatpush1.bf16.msra.mxu1 %v915_v8  ;;  %v922_v7 = vpack.c.bf16 %v642_v61, %v640_v60  ;;  %v641_v8 = vmax.f32 %v305_v3, 0.0  ;;  %v503_v50 = vld [vmem:[%s6698_s0 + $0x9a0] sm:$0xff]  ;;  %v510_v3 = vld [vmem:[%s6698_s0 + $0x9d8] sm:$0xff]  ;;  %v4926_v43 = vld [vmem:[%s5586_s8 + $0x388] ss:$44 sps:$4 sm:$0xff]  }
  0x6e   : > { %3495 = vmatpush1.bf16.msra.mxu0 %v1011_v9  ;;  %2767 = vmatprep.subr.bf16.mxu1 %v918_v20  ;;  %v831_v9 = vmax.f32 %v495_v5, 0.0  ;;  %v646_v20 = vmax.f32 %v310_v16, 0.0  ;;  %v315_v5 = vld [vmem:[%s6698_s0 + $0x3c0] sm:$0xff]  ;;  %v4920_v16 = vld [vmem:[%s5586_s8 + $0x330] ss:$44 sps:$4 sm:$0xff]  }
  0x6f   : > { %3496 = vmatprep.subr.bf16.mxu0 %v1014_v29  ;;  %v921_v12 = vpack.c.bf16 %v641_v8, %v639_v4  ;;  %v844_v4 = vmax.f32 %v508_v0, 0.0  ;;  %v651_v8 = vmax.f32 %v315_v5, 0.0  ;;  %v319_v30 = vld [vmem:[%s6698_s0 + $0x3e0] sm:$0xff]  ;;  %v4950_v5 = vld [vmem:[%s5586_s8 + $0x4e8] ss:$44 sps:$4 sm:$0xff]  }
  0x70   : > { %v1017_v13 = vpack.c.bf16 %v833_v10, %v831_v9  ;;  %v653_v9 = vmax.f32 %v317_v6, 0.0  ;;  %v507_v10 = vld [vmem:[%s6698_s0 + $0x9c0] sm:$0xff]  ;;  %v4951_v6 = vld [vmem:[%s5586_s8 + $0x52c] ss:$44 sps:$4 sm:$0xff]  }
  0x71   : > { %2768 = vmatpush1.bf16.msra.mxu1 %v917_v32  ;;  %v4911_v32 = vld [vmem:[%s5586_s8 + $0x2dc] ss:$44 sps:$4 sm:$0xff]   ;;  %v4941_v63 = vld [vmem:[%s5586_s8 + $0x494] ss:$44 sps:$4 sm:$0xff]   ;;  %v4943_v0 = vld [vmem:[%s5586_s8 + $0x478] ss:$44 sps:$4 sm:$0xff]  }
  0x72   : > { %3497 = vmatpush1.bf16.msra.mxu0 %v1013_v33  ;;  %2769 = vmatprep.subr.bf16.mxu1 %v920_v49  ;;  %v501_v33 = vld [vmem:[%s6698_s0 + $0x990] sm:$0xff]  ;;  %v927_v18 = vpack.c.bf16 %v653_v9, %v651_v8  ;;  %v4956_v9 = vld [vmem:[%s5586_s8 + $0x540] ss:$44 sps:$4 sm:$0xff]  }
  0x73   : > { %2589 = vmatmul.mubr.bf16.gmra.mrb[20].mxu1 %v4895_v15  ;;  %3498 = vmatprep.subr.bf16.mxu0 %v1016_v54  ;;  %v4907_v15 = vld [vmem:[%s5586_s8 + $0x268] ss:$44 sps:$4 sm:$0xff]   ;;  %v837_v36 = vmax.f32 %v501_v33, 0.0  ;;  %v839_v54 = vmax.f32 %v503_v50, 0.0  ;;  %v655_v33 = vmax.f32 %v319_v30, 0.0 }
  0x74   : > { %3318 = vmatmul.mubr.bf16.gmra.mrb[20].mxu0 %v4896_v19  ;;  %2598 = vmatprep.mubr.bf16.mxu1 %v4897_v28  ;;  %v502_v19 = vld [vmem:[%s6698_s0 + $0x998] sm:$0xff]  ;;  %v924_v28 = vpack.c.bf16 %v646_v20, %v644_v17  ;;  %v313_v49 = vld [vmem:[%s6698_s0 + $0x3b0] sm:$0xff] }
  0x75   : > { %3327 = vmatprep.mubr.bf16.mxu0 %v4899_v31  ;;  %2770 = vmatpush1.bf16.msra.mxu1 %v919_v55  ;;  %v838_v22 = vmax.f32 %v502_v19, 0.0  ;;  %v499_v31 = vld [vmem:[%s6698_s0 + $0x980] sm:$0xff]  ;;  %v4915_v55 = vld [vmem:[%s5586_s8 + $0x31c] ss:$44 sps:$4 sm:$0xff]   ;;  %v4989_v30 = vld [vmem:[%s5586_s8 + $0xc] ss:$44 sps:$4 sm:$0xff]  }
  0x76   : > { %3499 = vmatpush1.bf16.msra.mxu0 %v1015_v57  ;;  %2771 = vmatprep.subr.bf16.mxu1 %v922_v7  ;;  %v835_v34 = vmax.f32 %v499_v31, 0.0  ;;  %v1022_v57 = vpack.c.bf16 %v842_v47, %v840_v46  ;;  %v846_v7 = vmax.f32 %v510_v3, 0.0  ;;  %v4921_v19 = vld [vmem:[%s5586_s8 + $0x374] ss:$44 sps:$4 sm:$0xff]   ;;  %v326_v46 = vld [vmem:[%s6698_s0 + $0x418] sm:$0xff] }
  0x77   : > { %3500 = vmatprep.subr.bf16.mxu0 %v1018_v11  ;;  %v1020_v29 = vpack.c.bf16 %v838_v22, %v836_v21  ;;  %v509_v11 = vld [vmem:[%s6698_s0 + $0x9d0] sm:$0xff]  ;;  %v320_v21 = vld [vmem:[%s6698_s0 + $0x3e8] sm:$0xff]  ;;  %v322_v22 = vld [vmem:[%s6698_s0 + $0x3f8] sm:$0xff] }
  0x78   : > { %v1019_v37 = vpack.c.bf16 %v837_v36, %v835_v34  ;;  %v845_v14 = vmax.f32 %v509_v11, 0.0  ;;  %v1024_v17 = vpack.c.bf16 %v846_v7, %v844_v4  ;;  %v656_v23 = vmax.f32 %v320_v21, 0.0  ;;  %v511_v36 = vld [vmem:[%s6698_s0 + $0x9e0] sm:$0xff]  ;;  %v4947_v3 = vld [vmem:[%s5586_s8 + $0x4ec] ss:$44 sps:$4 sm:$0xff]  }
  0x79   : > { %2772 = vmatpush1.bf16.msra.mxu1 %v921_v12  ;;  %v928_v12 = vpack.c.bf16 %v654_v2, %v652_v1  ;;  %v847_v38 = vmax.f32 %v511_v36, 0.0  ;;  %v4929_v50 = vld [vmem:[%s5586_s8 + $0x3e4] ss:$44 sps:$4 sm:$0xff]   ;;  %v4945_v2 = vld [vmem:[%s5586_s8 + $0x4d4] ss:$44 sps:$4 sm:$0xff]   ;;  %v328_v36 = vld [vmem:[%s6698_s0 + $0x428] sm:$0xff] }
  0x7a   : > { %3501 = vmatpush1.bf16.msra.mxu0 %v1017_v13  ;;  %2773 = vmatprep.subr.bf16.mxu1 %v924_v28  ;;  %v843_v13 = vmax.f32 %v507_v10, 0.0  ;;  %v848_v28 = vmax.f32 %v512_v25, 0.0  ;;  %v4944_v1 = vld [vmem:[%s5586_s8 + $0x490] ss:$44 sps:$4 sm:$0xff]   ;;  %v4955_v8 = vld [vmem:[%s5586_s8 + $0x528] ss:$44 sps:$4 sm:$0xff]  }
  0x7b   : > { %2599 = vmatmul.mubr.bf16.gmra.mrb[24].mxu1 %v4901_v48  ;;  %3502 = vmatprep.subr.bf16.mxu0 %v1020_v29  ;;  %v311_v48 = vld [vmem:[%s6698_s0 + $0x3a0] sm:$0xff]  ;;  %v850_v29 = vmax.f32 %v514_v26, 0.0  ;;  %v4949_v4 = vld [vmem:[%s5586_s8 + $0x4d0] ss:$44 sps:$4 sm:$0xff]   ;;  %v4974_v21 = vld [vmem:[%s5586_s8 + $0x648] ss:$44 sps:$4 sm:$0xff]  }
  0x7c   : > { %3328 = vmatmul.mubr.bf16.gmra.mrb[24].mxu0 %v4902_v52  ;;  %2608 = vmatprep.mubr.bf16.mxu1 %v4903_v53  ;;  %v647_v51 = vmax.f32 %v311_v48, 0.0  ;;  %v649_v52 = vmax.f32 %v313_v49, 0.0  ;;  %v505_v53 = vld [vmem:[%s6698_s0 + $0x9b0] sm:$0xff]  ;;  %v1023_v20 = vpack.c.bf16 %v845_v14, %v843_v13  ;;  %v516_v48 = vld [vmem:[%s6698_s0 + $0xa08] sm:$0xff]  ;;  %v518_v49 = vld [vmem:[%s6698_s0 + $0xa18] sm:$0xff] }
  0x7d   : > { %3337 = vmatprep.mubr.bf16.mxu0 %v4905_v56  ;;  %2774 = vmatpush1.bf16.msra.mxu1 %v923_v35  ;;  %v926_v56 = vpack.c.bf16 %v650_v45, %v648_v41  ;;  %v841_v58 = vmax.f32 %v505_v53, 0.0  ;;  %v1026_v34 = vpack.c.bf16 %v850_v29, %v848_v28  ;;  %v4925_v41 = vld [vmem:[%s5586_s8 + $0x370] ss:$44 sps:$4 sm:$0xff]   ;;  %v324_v45 = vld [vmem:[%s6698_s0 + $0x408] sm:$0xff]  ;;  %v854_v53 = vmax.f32 %v518_v49, 0.0 }
  0x7e   : > { %3503 = vmatpush1.bf16.msra.mxu0 %v1019_v37  ;;  %v925_v60 = vpack.c.bf16 %v649_v52, %v647_v51  ;;  %v513_v37 = vld [vmem:[%s6698_s0 + $0x9f0] sm:$0xff]  ;;  %v660_v47 = vmax.f32 %v324_v45, 0.0  ;;  %v662_v51 = vmax.f32 %v326_v46, 0.0  ;;  %v852_v52 = vmax.f32 %v516_v48, 0.0  ;;  %v4959_v11 = vld [vmem:[%s5586_s8 + $0x59c] ss:$44 sps:$4 sm:$0xff]  }
  0x7f   : > { %2775 = vmatprep.subr.bf16.mxu1 %v926_v56  ;;  %3504 = vmatprep.subr.bf16.mxu0 %v1022_v57  ;;  %v1021_v61 = vpack.c.bf16 %v841_v58, %v839_v54  ;;  %v4931_v56 = vld [vmem:[%s5586_s8 + $0x3c8] ss:$44 sps:$4 sm:$0xff]   ;;  %v4932_v57 = vld [vmem:[%s5586_s8 + $0x3e0] ss:$44 sps:$4 sm:$0xff]   ;;  %v4933_v58 = vld [vmem:[%s5586_s8 + $0x424] ss:$44 sps:$4 sm:$0xff]  }
  0x80   : > { %v932_v54 = vpack.c.bf16 %v662_v51, %v660_v47  ;;  %v4953_v7 = vld [vmem:[%s5586_s8 + $0x544] ss:$44 sps:$4 sm:$0xff]   ;;  %v4963_v14 = vld [vmem:[%s5586_s8 + $0x5dc] ss:$44 sps:$4 sm:$0xff]   ;;  %v4980_v25 = vld [vmem:[%s5586_s8 + $0x6a0] ss:$44 sps:$4 sm:$0xff]  }
  0x81   : > { %2776 = vmatpush1.bf16.msra.mxu1 %v925_v60  ;;  %v4937_v60 = vld [vmem:[%s5586_s8 + $0x420] ss:$44 sps:$4 sm:$0xff]   ;;  %v4957_v10 = vld [vmem:[%s5586_s8 + $0x584] ss:$44 sps:$4 sm:$0xff]   ;;  %v4987_v45 = vld [vmem:[%s5586_s8 + $0x8] ss:$44 sps:$4 sm:$0xff]  }
  0x82   : > { %3505 = vmatpush1.bf16.msra.mxu0 %v1021_v61  ;;  %2777 = vmatprep.subr.bf16.mxu1 %v928_v12  ;;  %v4938_v61 = vld [vmem:[%s5586_s8 + $0x438] ss:$44 sps:$4 sm:$0xff]   ;;  %v4961_v12 = vld [vmem:[%s5586_s8 + $0x580] ss:$44 sps:$4 sm:$0xff]   ;;  %v664_v48 = vmax.f32 %v328_v36, 0.0 }
  0x83   : > { %2609 = vmatmul.mubr.bf16.gmra.mrb[28].mxu1 %v4907_v15  ;;  %v4919_v15 = vld [vmem:[%s5586_s8 + $0x318] ss:$44 sps:$4 sm:$0xff]   ;;  %3506 = vmatprep.subr.bf16.mxu0 %v1024_v17  ;;  %v4968_v17 = vld [vmem:[%s5586_s8 + $0x5f0] ss:$44 sps:$4 sm:$0xff]   ;;  %v4985_v28 = vld [vmem:[%s5586_s8 + $0x6e0] ss:$44 sps:$4 sm:$0xff]  }
  0x84   : > { %3338 = vmatmul.mubr.bf16.gmra.mrb[28].mxu0 %v4908_v24  ;;  %2618 = vmatprep.mubr.bf16.mxu1 %v4909_v27  ;;  %v658_v24 = vmax.f32 %v322_v22, 0.0  ;;  %v4923_v27 = vld [vmem:[%s5586_s8 + $0x38c] ss:$44 sps:$4 sm:$0xff]   ;;  %v4981_v26 = vld [vmem:[%s5586_s8 + $0x6e4] ss:$44 sps:$4 sm:$0xff]  }
  0x85   : > { %3347 = vmatprep.mubr.bf16.mxu0 %v4911_v32  ;;  %2778 = vmatpush1.bf16.msra.mxu1 %v927_v18  ;;  %v321_v32 = vld [vmem:[%s6698_s0 + $0x3f0] sm:$0xff]  ;;  %v4962_v13 = vld [vmem:[%s5586_s8 + $0x598] ss:$44 sps:$4 sm:$0xff]   ;;  %v4990_v51 = vld [vmem:[%s5586_s8 + $0x20] ss:$44 sps:$4 sm:$0xff]  }
  0x86   : > { %3507 = vmatpush1.bf16.msra.mxu0 %v1023_v20  ;;  %v930_v31 = vpack.c.bf16 %v658_v24, %v656_v23  ;;  %v657_v35 = vmax.f32 %v321_v32, 0.0  ;;  %v4969_v18 = vld [vmem:[%s5586_s8 + $0x634] ss:$44 sps:$4 sm:$0xff]   ;;  %v4973_v20 = vld [vmem:[%s5586_s8 + $0x630] ss:$44 sps:$4 sm:$0xff]  }
  0x87   : > { %3508 = vmatprep.subr.bf16.mxu0 %v1026_v34  ;;  %v4975_v22 = vld [vmem:[%s5586_s8 + $0x68c] ss:$44 sps:$4 sm:$0xff]   ;;  %v4977_v23 = vld [vmem:[%s5586_s8 + $0x6a4] ss:$44 sps:$4 sm:$0xff]   ;;  %v4979_v24 = vld [vmem:[%s5586_s8 + $0x688] ss:$44 sps:$4 sm:$0xff]  }
  0x88   : > { %2779 = vmatprep.subr.bf16.mxu1 %v930_v31  ;;  %v929_v40 = vpack.c.bf16 %v657_v35, %v655_v33  ;;  %v4986_v29 = vld [vmem:[%s5586_s8 + $0x6f8] ss:$44 sps:$4 sm:$0xff]   ;;  %v325_v33 = vld [vmem:[%s6698_s0 + $0x410] sm:$0xff] }
  0x89   : > { %v4992_v31 = vld [vmem:[%s5586_s8 + $0x24] ss:$44 sps:$4 sm:$0xff]   ;;  %v334_v49 = vld [vmem:[%s6698_s0 + $0x458] sm:$0xff]  ;;  %v5001_v36 = vld [vmem:[%s5586_s8 + $0xd4] ss:$44 sps:$4 sm:$0xff]  }
  0x8a   : > { %2780 = vmatpush1.bf16.msra.mxu1 %v929_v40  ;;  %v323_v32 = vld [vmem:[%s6698_s0 + $0x400] sm:$0xff]  ;;  %v517_v35 = vld [vmem:[%s6698_s0 + $0xa10] sm:$0xff] }
  0x8b   : > { %2619 = vmatmul.mubr.bf16.gmra.mrb[32].mxu1 %v4913_v39  ;;  %v849_v39 = vmax.f32 %v513_v37, 0.0  ;;  %2992 = vmatprep.subr.bf16.mxu1 %v932_v54  ;;  %v515_v34 = vld [vmem:[%s6698_s0 + $0xa00] sm:$0xff]  ;;  %v330_v37 = vld [vmem:[%s6698_s0 + $0x438] sm:$0xff]  ;;  %v659_v40 = vmax.f32 %v323_v32, 0.0  ;;  %v853_v47 = vmax.f32 %v517_v35, 0.0 }
  0x8c   : > { %3348 = vmatmul.mubr.bf16.gmra.mrb[32].mxu0 %v4914_v44  ;;  %2628 = vmatprep.mubr.bf16.mxu1 %v4915_v55  ;;  %v4927_v44 = vld [vmem:[%s5586_s8 + $0x3cc] ss:$44 sps:$4 sm:$0xff]   ;;  %v1028_v55 = vpack.c.bf16 %v854_v53, %v852_v52  ;;  %v851_v46 = vmax.f32 %v515_v34, 0.0  ;;  %v666_v52 = vmax.f32 %v330_v37, 0.0 }
  0x8d   : > { %3357 = vmatprep.mubr.bf16.mxu0 %v4917_v59  ;;  %v1025_v42 = vpack.c.bf16 %v849_v39, %v847_v38  ;;  %v4935_v59 = vld [vmem:[%s5586_s8 + $0x43c] ss:$44 sps:$4 sm:$0xff]   ;;  %v327_v38 = vld [vmem:[%s6698_s0 + $0x420] sm:$0xff]  ;;  %v329_v39 = vld [vmem:[%s6698_s0 + $0x430] sm:$0xff] }
  0x8e   : > { %v663_v53 = vmax.f32 %v327_v38, 0.0  ;;  %v665_v54 = vmax.f32 %v329_v39, 0.0  ;;  %v4998_v32 = vld [vmem:[%s5586_s8 + $0x78] ss:$44 sps:$4 sm:$0xff]  }
  0x8f   : > { %3509 = vmatpush1.bf16.msra.mxu0 %v1025_v42  ;;  %v332_v42 = vld [vmem:[%s6698_s0 + $0x448] sm:$0xff] }
  0x90   : > { %3721 = vmatprep.subr.bf16.mxu0 %v1028_v55  ;;  %v331_v55 = vld [vmem:[%s6698_s0 + $0x440] sm:$0xff] }
  0x93   : > { %2629 = vmatmul.mubr.bf16.gmra.mrb[36].mxu1 %v4919_v15  ;;  %v4965_v15 = vld [vmem:[%s5586_s8 + $0x5f4] ss:$44 sps:$4 sm:$0xff]  }
  0x94   : > { %3358 = vmatmul.mubr.bf16.gmra.mrb[36].mxu0 %v4920_v16  ;;  %2638 = vmatprep.mubr.bf16.mxu1 %v4921_v19  ;;  %v4967_v16 = vld [vmem:[%s5586_s8 + $0x5d8] ss:$44 sps:$4 sm:$0xff]  }
  0x95   : > { %3367 = vmatprep.mubr.bf16.mxu0 %v4923_v27  ;;  %v4971_v19 = vld [vmem:[%s5586_s8 + $0x64c] ss:$44 sps:$4 sm:$0xff]   ;;  %v4983_v27 = vld [vmem:[%s5586_s8 + $0x6fc] ss:$44 sps:$4 sm:$0xff]  }
  0x9b   : > { %2639 = vmatmul.mubr.bf16.gmra.mrb[40].mxu1 %v4925_v41  ;;  %v661_v41 = vmax.f32 %v325_v33, 0.0  ;;  %v4999_v33 = vld [vmem:[%s5586_s8 + $0xbc] ss:$44 sps:$4 sm:$0xff]  }
  0x9c   : > { %3368 = vmatmul.mubr.bf16.gmra.mrb[40].mxu0 %v4926_v43  ;;  %2648 = vmatprep.mubr.bf16.mxu1 %v4927_v44  ;;  %v520_v43 = vld [vmem:[%s6698_s0 + $0xa28] sm:$0xff]  ;;  %v522_v44 = vld [vmem:[%s6698_s0 + $0xa38] sm:$0xff] }
  0x9d   : > { %3377 = vmatprep.mubr.bf16.mxu0 %v4929_v50  ;;  %v519_v50 = vld [vmem:[%s6698_s0 + $0xa20] sm:$0xff] }
  0xa3   : > { %2649 = vmatmul.mubr.bf16.gmra.mrb[44].mxu1 %v4931_v56  ;;  %v521_v56 = vld [vmem:[%s6698_s0 + $0xa30] sm:$0xff] }
  0xa4   : > { %3378 = vmatmul.mubr.bf16.gmra.mrb[44].mxu0 %v4932_v57  ;;  %2658 = vmatprep.mubr.bf16.mxu1 %v4933_v58  ;;  %v524_v57 = vld [vmem:[%s6698_s0 + $0xa48] sm:$0xff]  ;;  %v4993_v58 = vld [vmem:[%s5586_s8 + $0x64] ss:$44 sps:$4 sm:$0xff]  }
  0xa5   : > { %3387 = vmatprep.mubr.bf16.mxu0 %v4935_v59  ;;  %v668_v59 = vmax.f32 %v332_v42, 0.0 }
  0xab   : > { %2659 = vmatmul.mubr.bf16.gmra.mrb[48].mxu1 %v4937_v60  ;;  %v333_v60 = vld [vmem:[%s6698_s0 + $0x450] sm:$0xff] }
  0xac   : > { %3388 = vmatmul.mubr.bf16.gmra.mrb[48].mxu0 %v4938_v61  ;;  %2668 = vmatprep.mubr.bf16.mxu1 %v4939_v62  ;;  %v336_v61 = vld [vmem:[%s6698_s0 + $0x468] sm:$0xff]  ;;  %v856_v62 = vmax.f32 %v520_v43, 0.0 }
  0xad   : > { %3397 = vmatprep.mubr.bf16.mxu0 %v4941_v63  ;;  %v858_v63 = vmax.f32 %v522_v44, 0.0 }
  0xb3   : > { %2669 = vmatmul.mubr.bf16.gmra.mrb[52].mxu1 %v4943_v0  ;;  %v526_v0 = vld [vmem:[%s6698_s0 + $0xa58] sm:$0xff] }
  0xb4   : > { %3398 = vmatmul.mubr.bf16.gmra.mrb[52].mxu0 %v4944_v1  ;;  %2678 = vmatprep.mubr.bf16.mxu1 %v4945_v2  ;;  %v931_v1 = vpack.c.bf16 %v661_v41, %v659_v40  ;;  %v4995_v2 = vld [vmem:[%s5586_s8 + $0x7c] ss:$44 sps:$4 sm:$0xff]   ;;  %v339_v40 = vld [vmem:[%s6698_s0 + $0x480] sm:$0xff]  ;;  %v341_v41 = vld [vmem:[%s6698_s0 + $0x490] sm:$0xff] }
  0xb5   : > { %3407 = vmatprep.mubr.bf16.mxu0 %v4947_v3  ;;  %v670_v3 = vmax.f32 %v334_v49, 0.0 }
  0xbb   : > { %2679 = vmatmul.mubr.bf16.gmra.mrb[56].mxu1 %v4949_v4  ;;  %v338_v4 = vld [vmem:[%s6698_s0 + $0x478] sm:$0xff] }
  0xbc   : > { %3408 = vmatmul.mubr.bf16.gmra.mrb[56].mxu0 %v4950_v5  ;;  %2688 = vmatprep.mubr.bf16.mxu1 %v4951_v6  ;;  %v855_v5 = vmax.f32 %v519_v50, 0.0  ;;  %v523_v6 = vld [vmem:[%s6698_s0 + $0xa40] sm:$0xff] }
  0xbd   : > { %3417 = vmatprep.mubr.bf16.mxu0 %v4953_v7  ;;  %v525_v7 = vld [vmem:[%s6698_s0 + $0xa50] sm:$0xff] }
  0xc3   : > { %2689 = vmatmul.mubr.bf16.gmra.mrb[60].mxu1 %v4955_v8  ;;  %v1027_v8 = vpack.c.bf16 %v853_v47, %v851_v46  ;;  %v346_v46 = vld [vmem:[%s6698_s0 + $0x4b8] sm:$0xff] }
  0xc4   : > { %3418 = vmatmul.mubr.bf16.gmra.mrb[60].mxu0 %v4956_v9  ;;  %2698 = vmatprep.mubr.bf16.mxu1 %v4957_v10  ;;  %v857_v9 = vmax.f32 %v521_v56, 0.0  ;;  %v860_v10 = vmax.f32 %v524_v57, 0.0  ;;  %v343_v56 = vld [vmem:[%s6698_s0 + $0x4a0] sm:$0xff]  ;;  %v345_v57 = vld [vmem:[%s6698_s0 + $0x4b0] sm:$0xff] }
  0xc5   : > { %3427 = vmatprep.mubr.bf16.mxu0 %v4959_v11  ;;  %v934_v11 = vpack.c.bf16 %v666_v52, %v664_v48  ;;  %v5003_v52 = vld [vmem:[%s5586_s8 + $0xb8] ss:$44 sps:$4 sm:$0xff]  }
  0xcb   : > { %2699 = vmatmul.mubr.bf16.gmra.mrb[64].mxu1 %v4961_v12  ;;  %v862_v12 = vmax.f32 %v526_v0, 0.0  ;;  %v5004_v0 = vld [vmem:[%s5586_s8 + $0xd0] ss:$44 sps:$4 sm:$0xff]  }
  0xcc   : > { %3428 = vmatmul.mubr.bf16.gmra.mrb[64].mxu0 %v4962_v13  ;;  %2708 = vmatprep.mubr.bf16.mxu1 %v4963_v14  ;;  %v528_v13 = vld [vmem:[%s6698_s0 + $0xa68] sm:$0xff]  ;;  %v667_v14 = vmax.f32 %v331_v55, 0.0  ;;  %v677_v55 = vmax.f32 %v341_v41, 0.0 }
  0xcd   : > { %3437 = vmatprep.mubr.bf16.mxu0 %v4965_v15  ;;  %v335_v15 = vld [vmem:[%s6698_s0 + $0x460] sm:$0xff]  ;;  %v1032_v34 = vpack.c.bf16 %v862_v12, %v860_v10  ;;  %v864_v35 = vmax.f32 %v528_v13, 0.0  ;;  %v349_v10 = vld [vmem:[%s6698_s0 + $0x4d0] sm:$0xff]  ;;  %v354_v12 = vld [vmem:[%s6698_s0 + $0x4f8] sm:$0xff] }
  0xce   : > { %v671_v38 = vmax.f32 %v335_v15, 0.0  ;;  %v685_v15 = vmax.f32 %v349_v10, 0.0  ;;  %v5025_v10 = vld [vmem:[%s5586_s8 + $0x234] ss:$44 sps:$4 sm:$0xff]  }
  0xd3   : > { %2709 = vmatmul.mubr.bf16.gmra.mrb[68].mxu1 %v4967_v16  ;;  %v337_v16 = vld [vmem:[%s6698_s0 + $0x470] sm:$0xff] }
  0xd4   : > { %3438 = vmatmul.mubr.bf16.gmra.mrb[68].mxu0 %v4968_v17  ;;  %2718 = vmatprep.mubr.bf16.mxu1 %v4969_v18  ;;  %v1030_v17 = vpack.c.bf16 %v858_v63, %v856_v62  ;;  %v933_v18 = vpack.c.bf16 %v665_v54, %v663_v53  ;;  %v673_v39 = vmax.f32 %v337_v16, 0.0  ;;  %v675_v54 = vmax.f32 %v339_v40, 0.0  ;;  %v350_v62 = vld [vmem:[%s6698_s0 + $0x4d8] sm:$0xff] }
  0xd5   : > { %3447 = vmatprep.mubr.bf16.mxu0 %v4971_v19  ;;  %v936_v19 = vpack.c.bf16 %v670_v3, %v668_v59 }
  0xd6   : > { %v937_v53 = vpack.c.bf16 %v673_v39, %v671_v38  ;;  %v939_v3 = vpack.c.bf16 %v677_v55, %v675_v54 }
  0xdb   : > { %2719 = vmatmul.mubr.bf16.gmra.mrb[72].mxu1 %v4973_v20  ;;  %v669_v20 = vmax.f32 %v333_v60, 0.0  ;;  %v682_v60 = vmax.f32 %v346_v46, 0.0  ;;  %v364_v46 = vld [vmem:[%s6698_s0 + $0x548] sm:$0xff] }
  0xdc   : > { %3448 = vmatmul.mubr.bf16.gmra.mrb[72].mxu0 %v4974_v21  ;;  %2728 = vmatprep.mubr.bf16.mxu1 %v4975_v22  ;;  %v672_v21 = vmax.f32 %v336_v61, 0.0  ;;  %v340_v22 = vld [vmem:[%s6698_s0 + $0x488] sm:$0xff]  ;;  %v700_v55 = vmax.f32 %v364_v46, 0.0 }
  0xdd   : > { %3457 = vmatprep.mubr.bf16.mxu0 %v4977_v23  ;;  %v342_v23 = vld [vmem:[%s6698_s0 + $0x498] sm:$0xff]  ;;  %v935_v42 = vpack.c.bf16 %v669_v20, %v667_v14  ;;  %v676_v43 = vmax.f32 %v340_v22, 0.0  ;;  %v348_v61 = vld [vmem:[%s6698_s0 + $0x4c8] sm:$0xff]  ;;  %v353_v20 = vld [vmem:[%s6698_s0 + $0x4f0] sm:$0xff] }
  0xde   : > { %v678_v44 = vmax.f32 %v342_v23, 0.0  ;;  %v356_v22 = vld [vmem:[%s6698_s0 + $0x508] sm:$0xff]  ;;  %v358_v23 = vld [vmem:[%s6698_s0 + $0x518] sm:$0xff] }
  0xe3   : > { %2729 = vmatmul.mubr.bf16.gmra.mrb[76].mxu1 %v4979_v24  ;;  %v530_v24 = vld [vmem:[%s6698_s0 + $0xa78] sm:$0xff] }
  0xe4   : > { %3458 = vmatmul.mubr.bf16.gmra.mrb[76].mxu0 %v4980_v25  ;;  %2738 = vmatprep.mubr.bf16.mxu1 %v4981_v26  ;;  %v4997_v25 = vld [vmem:[%s5586_s8 + $0x60] ss:$44 sps:$4 sm:$0xff]   ;;  %v674_v26 = vmax.f32 %v338_v4, 0.0  ;;  %v866_v37 = vmax.f32 %v530_v24, 0.0  ;;  %v679_v4 = vmax.f32 %v343_v56, 0.0 }
  0xe5   : > { %3467 = vmatprep.mubr.bf16.mxu0 %v4983_v27  ;;  %v1029_v27 = vpack.c.bf16 %v857_v9, %v855_v5  ;;  %v681_v5 = vmax.f32 %v345_v57, 0.0  ;;  %v347_v9 = vld [vmem:[%s6698_s0 + $0x4c0] sm:$0xff]  ;;  %v5010_v24 = vld [vmem:[%s5586_s8 + $0x128] ss:$44 sps:$4 sm:$0xff]  }
  0xe6   : > { %v938_v47 = vpack.c.bf16 %v674_v26, %v672_v21  ;;  %v683_v14 = vmax.f32 %v347_v9, 0.0  ;;  %v5009_v21 = vld [vmem:[%s5586_s8 + $0x110] ss:$44 sps:$4 sm:$0xff]   ;;  %v363_v57 = vld [vmem:[%s6698_s0 + $0x540] sm:$0xff] }
  0xe7   : > { %v941_v13 = vpack.c.bf16 %v681_v5, %v679_v4  ;;  %v5013_v26 = vld [vmem:[%s5586_s8 + $0x184] ss:$44 sps:$4 sm:$0xff]   ;;  %v5021_v5 = vld [vmem:[%s5586_s8 + $0x1c0] ss:$44 sps:$4 sm:$0xff]   ;;  %v5023_v9 = vld [vmem:[%s5586_s8 + $0x21c] ss:$44 sps:$4 sm:$0xff]  }
  0xe8   : > { %v369_v4 = vld [vmem:[%s6698_s0 + $0x570] sm:$0xff] }
  0xeb   : > { %2739 = vmatmul.mubr.bf16.gmra.mrb[80].mxu1 %v4985_v28  ;;  %v859_v28 = vmax.f32 %v523_v6, 0.0 }
  0xec   : > { %3468 = vmatmul.mubr.bf16.gmra.mrb[80].mxu0 %v4986_v29  ;;  %2781 = vmatprep.mubr.bf16.mxu1 %v4989_v30  ;;  %v861_v29 = vmax.f32 %v525_v7, 0.0  ;;  %v527_v30 = vld [vmem:[%s6698_s0 + $0xa60] sm:$0xff]  ;;  %v684_v7 = vmax.f32 %v348_v61, 0.0 }
  0xed   : > { %3510 = vmatprep.mubr.bf16.mxu0 %v4992_v31  ;;  %v529_v31 = vld [vmem:[%s6698_s0 + $0xa70] sm:$0xff]  ;;  %v863_v49 = vmax.f32 %v527_v30, 0.0 }
  0xee   : > { %v1031_v48 = vpack.c.bf16 %v861_v29, %v859_v28  ;;  %v865_v50 = vmax.f32 %v529_v31, 0.0  ;;  %v689_v29 = vmax.f32 %v353_v20, 0.0  ;;  %v692_v31 = vmax.f32 %v356_v22, 0.0  ;;  %v378_v20 = vld [vmem:[%s6698_s0 + $0x5b8] sm:$0xff] }
  0xf0   : > { %v1033_v63 = vpack.c.bf16 %v865_v50, %v863_v49  ;;  %v5017_v49 = vld [vmem:[%s5586_s8 + $0x1c4] ss:$44 sps:$4 sm:$0xff]   ;;  %v5019_v50 = vld [vmem:[%s5586_s8 + $0x1dc] ss:$44 sps:$4 sm:$0xff]  }
  0xf3   : > { %2782 = vmatmul.mubr.bf16.vlgmr.msra.gmra.mrb[0].mxu1 %v4987_v45  ;;  %v344_v45 = vld [vmem:[%s6698_s0 + $0x4a8] sm:$0xff] }
  0xf4   : > { %3511 = vmatmul.mubr.bf16.vlgmr.msra.gmra.mrb[0].mxu0 %v4990_v51  ;;  %2993 = vmatpush1.bf16.msra.mxu1 %v931_v1  ;;  %v1034_v51 = vpack.c.bf16 %v866_v37, %v864_v35  ;;  %v680_v59 = vmax.f32 %v344_v45, 0.0  ;;  %v5005_v1 = vld [vmem:[%s5586_s8 + $0x114] ss:$44 sps:$4 sm:$0xff]   ;;  %v360_v35 = vld [vmem:[%s6698_s0 + $0x528] sm:$0xff] }
  0xf5   : > { %3722 = vmatpush1.bf16.msra.mxu0 %v1027_v8  ;;  %2791 = vmatprep.mubr.bf16.mxu1 %v4993_v58  ;;  %v940_v58 = vpack.c.bf16 %v678_v44, %v676_v43  ;;  %v686_v8 = vmax.f32 %v350_v62, 0.0  ;;  %v696_v41 = vmax.f32 %v360_v35, 0.0  ;;  %v359_v43 = vld [vmem:[%s6698_s0 + $0x520] sm:$0xff]  ;;  %v361_v44 = vld [vmem:[%s6698_s0 + $0x530] sm:$0xff]  ;;  %v699_v62 = vmax.f32 %v363_v57, 0.0 }
  0xf6   : > { %3520 = vmatprep.mubr.bf16.mxu0 %v4995_v2  ;;  %2994 = vmatprep.subr.bf16.mxu1 %v934_v11  ;;  %v5007_v2 = vld [vmem:[%s5586_s8 + $0x12c] ss:$44 sps:$4 sm:$0xff]   ;;  %v942_v6 = vpack.c.bf16 %v682_v60, %v680_v59  ;;  %v5015_v45 = vld [vmem:[%s5586_s8 + $0x168] ss:$44 sps:$4 sm:$0xff]  }
  0xf7   : > { %3723 = vmatprep.subr.bf16.mxu0 %v1030_v17  ;;  %v352_v11 = vld [vmem:[%s6698_s0 + $0x4e8] sm:$0xff]  ;;  %v944_v16 = vpack.c.bf16 %v686_v8, %v684_v7  ;;  %v370_v60 = vld [vmem:[%s6698_s0 + $0x578] sm:$0xff] }
  0xf8   : > { %2995 = vmatpush1.bf16.msra.mxu1 %v933_v18  ;;  %v688_v17 = vmax.f32 %v352_v11, 0.0  ;;  %v690_v18 = vmax.f32 %v354_v12, 0.0  ;;  %v368_v59 = vld [vmem:[%s6698_s0 + $0x568] sm:$0xff]  ;;  %v374_v7 = vld [vmem:[%s6698_s0 + $0x598] sm:$0xff] }
  0xf9   : > { %2996 = vmatprep.subr.bf16.mxu1 %v936_v19  ;;  %3724 = vmatpush1.bf16.msra.mxu0 %v1029_v27  ;;  %v351_v19 = vld [vmem:[%s6698_s0 + $0x4e0] sm:$0xff]  ;;  %v943_v27 = vpack.c.bf16 %v685_v15, %v683_v14 }
  0xfa   : > { %3725 = vmatprep.subr.bf16.mxu0 %v1032_v34  ;;  %v687_v28 = vmax.f32 %v351_v19, 0.0  ;;  %v946_v30 = vpack.c.bf16 %v690_v18, %v688_v17  ;;  %v357_v34 = vld [vmem:[%s6698_s0 + $0x510] sm:$0xff]  ;;  %v5022_v8 = vld [vmem:[%s5586_s8 + $0x1d8] ss:$44 sps:$4 sm:$0xff]   ;;  %v376_v19 = vld [vmem:[%s6698_s0 + $0x5a8] sm:$0xff] }
  0xfb   : > { %2792 = vmatmul.mubr.bf16.gmra.mrb[4].mxu1 %v4997_v25  ;;  %v5011_v25 = vld [vmem:[%s5586_s8 + $0x16c] ss:$44 sps:$4 sm:$0xff]   ;;  %v693_v39 = vmax.f32 %v357_v34, 0.0  ;;  %v371_v17 = vld [vmem:[%s6698_s0 + $0x580] sm:$0xff]  ;;  %v373_v18 = vld [vmem:[%s6698_s0 + $0x590] sm:$0xff] }
  0xfc   : > { %3521 = vmatmul.mubr.bf16.gmra.mrb[4].mxu0 %v4998_v32  ;;  %2801 = vmatprep.mubr.bf16.mxu1 %v4999_v33  ;;  %v694_v32 = vmax.f32 %v358_v23, 0.0  ;;  %v355_v33 = vld [vmem:[%s6698_s0 + $0x500] sm:$0xff]  ;;  %v945_v37 = vpack.c.bf16 %v689_v29, %v687_v28  ;;  %v707_v22 = vmax.f32 %v371_v17, 0.0  ;;  %v709_v23 = vmax.f32 %v373_v18, 0.0  ;;  %v377_v28 = vld [vmem:[%s6698_s0 + $0x5b0] sm:$0xff] }
  0xfd   : > { %3530 = vmatprep.mubr.bf16.mxu0 %v5001_v36  ;;  %2997 = vmatpush1.bf16.msra.mxu1 %v935_v42  ;;  %v362_v36 = vld [vmem:[%s6698_s0 + $0x538] sm:$0xff]  ;;  %v691_v38 = vmax.f32 %v355_v33, 0.0  ;;  %v5029_v33 = vld [vmem:[%s5586_s8 + $0x274] ss:$44 sps:$4 sm:$0xff]  }
  0xfe   : > { %2998 = vmatprep.subr.bf16.mxu1 %v938_v47  ;;  %3726 = vmatpush1.bf16.msra.mxu0 %v1031_v48  ;;  %v948_v40 = vpack.c.bf16 %v694_v32, %v692_v31  ;;  %v698_v42 = vmax.f32 %v362_v36, 0.0  ;;  %v366_v47 = vld [vmem:[%s6698_s0 + $0x558] sm:$0xff]  ;;  %v5016_v48 = vld [vmem:[%s5586_s8 + $0x180] ss:$44 sps:$4 sm:$0xff]   ;;  %v955_v35 = vpack.c.bf16 %v709_v23, %v707_v22 }
  0xff   : > { %3727 = vmatprep.subr.bf16.mxu0 %v1034_v51  ;;  %v947_v51 = vpack.c.bf16 %v693_v39, %v691_v38  ;;  %v702_v56 = vmax.f32 %v366_v47, 0.0  ;;  %v5027_v29 = vld [vmem:[%s5586_s8 + $0x218] ss:$44 sps:$4 sm:$0xff]   ;;  %v5028_v32 = vld [vmem:[%s5586_s8 + $0x230] ss:$44 sps:$4 sm:$0xff]  }
 0x100   : > { %v950_v54 = vpack.c.bf16 %v698_v42, %v696_v41  ;;  %v382_v31 = vld [vmem:[%s6698_s0 + $0x5d8] sm:$0xff]  ;;  %v379_v41 = vld [vmem:[%s6698_s0 + $0x5c0] sm:$0xff]  ;;  %v381_v42 = vld [vmem:[%s6698_s0 + $0x5d0] sm:$0xff] }
 0x101   : > { %2999 = vmatpush1.bf16.msra.mxu1 %v937_v53  ;;  %v697_v53 = vmax.f32 %v361_v44, 0.0  ;;  %v5031_v34 = vld [vmem:[%s5586_s8 + $0x28c] ss:$44 sps:$4 sm:$0xff]   ;;  %v715_v46 = vmax.f32 %v379_v41, 0.0  ;;  %v717_v47 = vmax.f32 %v381_v42, 0.0 }
 0x102   : > { %3000 = vmatprep.subr.bf16.mxu1 %v940_v58  ;;  %3728 = vmatpush1.bf16.msra.mxu0 %v1033_v63  ;;  %v365_v58 = vld [vmem:[%s6698_s0 + $0x550] sm:$0xff]  ;;  %v386_v44 = vld [vmem:[%s6698_s0 + $0x5f8] sm:$0xff]  ;;  %v5069_v18 = vld [vmem:[%s5586_s8 + $0x480] ss:$44 sps:$4 sm:$0xff]  }
 0x103   : > { %2802 = vmatmul.mubr.bf16.gmra.mrb[8].mxu1 %v5003_v52  ;;  %v695_v52 = vmax.f32 %v359_v43, 0.0  ;;  %v701_v63 = vmax.f32 %v365_v58, 0.0  ;;  %v384_v43 = vld [vmem:[%s6698_s0 + $0x5e8] sm:$0xff]  ;;  %v959_v57 = vpack.c.bf16 %v717_v47, %v715_v46  ;;  %v5075_v22 = vld [vmem:[%s5586_s8 + $0x4d8] ss:$44 sps:$4 sm:$0xff]  }
 0x104   : > { %3531 = vmatmul.mubr.bf16.gmra.mrb[8].mxu0 %v5004_v0  ;;  %2811 = vmatprep.mubr.bf16.mxu1 %v5005_v1  ;;  %v952_v0 = vpack.c.bf16 %v702_v56, %v700_v55  ;;  %v704_v1 = vmax.f32 %v368_v59, 0.0  ;;  %v5035_v55 = vld [vmem:[%s5586_s8 + $0x2cc] ss:$44 sps:$4 sm:$0xff]   ;;  %v5037_v56 = vld [vmem:[%s5586_s8 + $0x2e4] ss:$44 sps:$4 sm:$0xff]  }
 0x105   : > { %3540 = vmatprep.mubr.bf16.mxu0 %v5007_v2  ;;  %3001 = vmatpush1.bf16.msra.mxu1 %v939_v3  ;;  %v949_v61 = vpack.c.bf16 %v697_v53, %v695_v52  ;;  %v706_v2 = vmax.f32 %v370_v60, 0.0  ;;  %v367_v3 = vld [vmem:[%s6698_s0 + $0x560] sm:$0xff]  ;;  %v951_v11 = vpack.c.bf16 %v701_v63, %v699_v62  ;;  %v385_v52 = vld [vmem:[%s6698_s0 + $0x5f0] sm:$0xff]  ;;  %v5067_v17 = vld [vmem:[%s5586_s8 + $0x49c] ss:$44 sps:$4 sm:$0xff]  }
 0x106   : > { %3002 = vmatprep.subr.bf16.mxu1 %v942_v6  ;;  %v372_v6 = vld [vmem:[%s6698_s0 + $0x588] sm:$0xff]  ;;  %v703_v12 = vmax.f32 %v367_v3, 0.0  ;;  %v5033_v53 = vld [vmem:[%s5586_s8 + $0x270] ss:$44 sps:$4 sm:$0xff]   ;;  %v721_v59 = vmax.f32 %v385_v52, 0.0 }
 0x107   : > { %v954_v14 = vpack.c.bf16 %v706_v2, %v704_v1  ;;  %v708_v15 = vmax.f32 %v372_v6, 0.0  ;;  %v5039_v62 = vld [vmem:[%s5586_s8 + $0x2c8] ss:$44 sps:$4 sm:$0xff]   ;;  %v5040_v63 = vld [vmem:[%s5586_s8 + $0x2e0] ss:$44 sps:$4 sm:$0xff]  }
 0x108   : > { %v5043_v1 = vld [vmem:[%s5586_s8 + $0x33c] ss:$44 sps:$4 sm:$0xff]   ;;  %v5045_v2 = vld [vmem:[%s5586_s8 + $0x320] ss:$44 sps:$4 sm:$0xff]   ;;  %v5046_v3 = vld [vmem:[%s5586_s8 + $0x338] ss:$44 sps:$4 sm:$0xff]  }
 0x109   : > { %3003 = vmatpush1.bf16.msra.mxu1 %v941_v13  ;;  %v705_v13 = vmax.f32 %v369_v4, 0.0  ;;  %v5047_v4 = vld [vmem:[%s5586_s8 + $0x37c] ss:$44 sps:$4 sm:$0xff]   ;;  %v5051_v6 = vld [vmem:[%s5586_s8 + $0x378] ss:$44 sps:$4 sm:$0xff]  }
 0x10a   : > { %3004 = vmatprep.subr.bf16.mxu1 %v944_v16  ;;  %v710_v16 = vmax.f32 %v374_v7, 0.0  ;;  %v5052_v7 = vld [vmem:[%s5586_s8 + $0x390] ss:$44 sps:$4 sm:$0xff]   ;;  %v5103_v41 = vld [vmem:[%s5586_s8 + $0x6ac] ss:$44 sps:$4 sm:$0xff]  }
 0x10b   : > { %2812 = vmatmul.mubr.bf16.gmra.mrb[12].mxu1 %v5009_v21  ;;  %v953_v21 = vpack.c.bf16 %v705_v13, %v703_v12  ;;  %v5059_v12 = vld [vmem:[%s5586_s8 + $0x42c] ss:$44 sps:$4 sm:$0xff]   ;;  %v5061_v13 = vld [vmem:[%s5586_s8 + $0x444] ss:$44 sps:$4 sm:$0xff]   ;;  %v5111_v46 = vld [vmem:[%s5586_s8 + $0x6e8] ss:$44 sps:$4 sm:$0xff]  }
 0x10c   : > { %3541 = vmatmul.mubr.bf16.gmra.mrb[12].mxu0 %v5010_v24  ;;  %2821 = vmatprep.mubr.bf16.mxu1 %v5011_v25  ;;  %v956_v24 = vpack.c.bf16 %v710_v16, %v708_v15  ;;  %v712_v25 = vmax.f32 %v376_v19, 0.0  ;;  %v5064_v15 = vld [vmem:[%s5586_s8 + $0x440] ss:$44 sps:$4 sm:$0xff]   ;;  %v5065_v16 = vld [vmem:[%s5586_s8 + $0x484] ss:$44 sps:$4 sm:$0xff]  }
 0x10d   : > { %3550 = vmatprep.mubr.bf16.mxu0 %v5013_v26  ;;  %3005 = vmatpush1.bf16.msra.mxu1 %v943_v27  ;;  %v714_v26 = vmax.f32 %v378_v20, 0.0  ;;  %v375_v27 = vld [vmem:[%s6698_s0 + $0x5a0] sm:$0xff]  ;;  %v5071_v20 = vld [vmem:[%s5586_s8 + $0x4dc] ss:$44 sps:$4 sm:$0xff]   ;;  %v5117_v52 = vld [vmem:[%s5586_s8 + $0x6c] ss:$44 sps:$4 sm:$0xff]  }
 0x10e   : > { %3006 = vmatprep.subr.bf16.mxu1 %v946_v30  ;;  %v380_v30 = vld [vmem:[%s6698_s0 + $0x5c8] sm:$0xff]  ;;  %v711_v36 = vmax.f32 %v375_v27, 0.0  ;;  %v5070_v19 = vld [vmem:[%s5586_s8 + $0x498] ss:$44 sps:$4 sm:$0xff]   ;;  %v5076_v23 = vld [vmem:[%s5586_s8 + $0x4f0] ss:$44 sps:$4 sm:$0xff]  }
 0x10f   : > { %v958_v38 = vpack.c.bf16 %v714_v26, %v712_v25  ;;  %v716_v39 = vmax.f32 %v380_v30, 0.0  ;;  %v5079_v25 = vld [vmem:[%s5586_s8 + $0x54c] ss:$44 sps:$4 sm:$0xff]   ;;  %v5081_v26 = vld [vmem:[%s5586_s8 + $0x530] ss:$44 sps:$4 sm:$0xff]  }
 0x110   : > { %v5082_v27 = vld [vmem:[%s5586_s8 + $0x548] ss:$44 sps:$4 sm:$0xff]   ;;  %v5105_v42 = vld [vmem:[%s5586_s8 + $0x690] ss:$44 sps:$4 sm:$0xff]   ;;  %v5112_v47 = vld [vmem:[%s5586_s8 + $0x700] ss:$44 sps:$4 sm:$0xff]  }
 0x111   : > { %3007 = vmatpush1.bf16.msra.mxu1 %v945_v37  ;;  %v713_v37 = vmax.f32 %v377_v28, 0.0  ;;  %v5083_v28 = vld [vmem:[%s5586_s8 + $0x58c] ss:$44 sps:$4 sm:$0xff]   ;;  %v5087_v30 = vld [vmem:[%s5586_s8 + $0x588] ss:$44 sps:$4 sm:$0xff]  }
 0x112   : > { %3008 = vmatprep.subr.bf16.mxu1 %v948_v40  ;;  %v718_v40 = vmax.f32 %v382_v31, 0.0  ;;  %v5088_v31 = vld [vmem:[%s5586_s8 + $0x5a0] ss:$44 sps:$4 sm:$0xff]  }
 0x113   : > { %2822 = vmatmul.mubr.bf16.gmra.mrb[16].mxu1 %v5015_v45  ;;  %v957_v45 = vpack.c.bf16 %v713_v37, %v711_v36  ;;  %v5095_v36 = vld [vmem:[%s5586_s8 + $0x63c] ss:$44 sps:$4 sm:$0xff]   ;;  %v5097_v37 = vld [vmem:[%s5586_s8 + $0x654] ss:$44 sps:$4 sm:$0xff]  }
 0x114   : > { %3551 = vmatmul.mubr.bf16.gmra.mrb[16].mxu0 %v5016_v48  ;;  %2831 = vmatprep.mubr.bf16.mxu1 %v5017_v49  ;;  %v960_v48 = vpack.c.bf16 %v718_v40, %v716_v39  ;;  %v720_v49 = vmax.f32 %v384_v43, 0.0  ;;  %v5100_v39 = vld [vmem:[%s5586_s8 + $0x650] ss:$44 sps:$4 sm:$0xff]   ;;  %v5101_v40 = vld [vmem:[%s5586_s8 + $0x694] ss:$44 sps:$4 sm:$0xff]  }
 0x115   : > { %3560 = vmatprep.mubr.bf16.mxu0 %v5019_v50  ;;  %3009 = vmatpush1.bf16.msra.mxu1 %v947_v51  ;;  %v722_v50 = vmax.f32 %v386_v44, 0.0  ;;  %v383_v51 = vld [vmem:[%s6698_s0 + $0x5e0] sm:$0xff]  ;;  %v5106_v43 = vld [vmem:[%s5586_s8 + $0x6a8] ss:$44 sps:$4 sm:$0xff]   ;;  %v5107_v44 = vld [vmem:[%s5586_s8 + $0x6ec] ss:$44 sps:$4 sm:$0xff]  }
 0x116   : > { %3010 = vmatprep.subr.bf16.mxu1 %v950_v54  ;;  %v5034_v54 = vld [vmem:[%s5586_s8 + $0x288] ss:$44 sps:$4 sm:$0xff]   ;;  %v719_v58 = vmax.f32 %v383_v51, 0.0 }
 0x117   : > { %v962_v60 = vpack.c.bf16 %v722_v50, %v720_v49  ;;  %v5221_v49 = vmov 0   ;;  %v5113_v50 = vld [vmem:[%s5586_s8 + $0x10] ss:$44 sps:$4 sm:$0xff]   ;;  %v5116_v51 = vld [vmem:[%s5586_s8 + $0x28] ss:$44 sps:$4 sm:$0xff]  }
 0x119   : > { %3011 = vmatpush1.bf16.msra.mxu1 %v949_v61  ;;  %v961_v61 = vpack.c.bf16 %v721_v59, %v719_v58  ;;  %v5125_v58 = vld [vmem:[%s5586_s8 + $0x11c] ss:$44 sps:$4 sm:$0xff]   ;;  %v5127_v59 = vld [vmem:[%s5586_s8 + $0x118] ss:$44 sps:$4 sm:$0xff]  }
 0x11a   : > { %3012 = vmatprep.subr.bf16.mxu1 %v952_v0  ;;  %v5041_v0 = vld [vmem:[%s5586_s8 + $0x324] ss:$44 sps:$4 sm:$0xff]  }
 0x11b   : > { %2832 = vmatmul.mubr.bf16.gmra.mrb[20].mxu1 %v5021_v5  ;;  %v5049_v5 = vld [vmem:[%s5586_s8 + $0x394] ss:$44 sps:$4 sm:$0xff]  }
 0x11c   : > { %3561 = vmatmul.mubr.bf16.gmra.mrb[20].mxu0 %v5022_v8  ;;  %2841 = vmatprep.mubr.bf16.mxu1 %v5023_v9  ;;  %v5053_v8 = vld [vmem:[%s5586_s8 + $0x3d4] ss:$44 sps:$4 sm:$0xff]   ;;  %v5055_v9 = vld [vmem:[%s5586_s8 + $0x3ec] ss:$44 sps:$4 sm:$0xff]  }
 0x11d   : > { %3570 = vmatprep.mubr.bf16.mxu0 %v5025_v10  ;;  %3013 = vmatpush1.bf16.msra.mxu1 %v951_v11  ;;  %v5057_v10 = vld [vmem:[%s5586_s8 + $0x3d0] ss:$44 sps:$4 sm:$0xff]   ;;  %v5058_v11 = vld [vmem:[%s5586_s8 + $0x3e8] ss:$44 sps:$4 sm:$0xff]  }
 0x11e   : > { %3014 = vmatprep.subr.bf16.mxu1 %v954_v14  ;;  %v5063_v14 = vld [vmem:[%s5586_s8 + $0x428] ss:$44 sps:$4 sm:$0xff]  }
 0x121   : > { %3015 = vmatpush1.bf16.msra.mxu1 %v953_v21  ;;  %v5073_v21 = vld [vmem:[%s5586_s8 + $0x4f4] ss:$44 sps:$4 sm:$0xff]  }
 0x122   : > { %3016 = vmatprep.subr.bf16.mxu1 %v956_v24  ;;  %v5077_v24 = vld [vmem:[%s5586_s8 + $0x534] ss:$44 sps:$4 sm:$0xff]  }
 0x123   : > { %2842 = vmatmul.mubr.bf16.gmra.mrb[24].mxu1 %v5027_v29  ;;  %v5085_v29 = vld [vmem:[%s5586_s8 + $0x5a4] ss:$44 sps:$4 sm:$0xff]  }
 0x124   : > { %3571 = vmatmul.mubr.bf16.gmra.mrb[24].mxu0 %v5028_v32  ;;  %2851 = vmatprep.mubr.bf16.mxu1 %v5029_v33  ;;  %v5089_v32 = vld [vmem:[%s5586_s8 + $0x5e4] ss:$44 sps:$4 sm:$0xff]   ;;  %v5091_v33 = vld [vmem:[%s5586_s8 + $0x5fc] ss:$44 sps:$4 sm:$0xff]  }
 0x125   : > { %3580 = vmatprep.mubr.bf16.mxu0 %v5031_v34  ;;  %3017 = vmatpush1.bf16.msra.mxu1 %v955_v35  ;;  %v5093_v34 = vld [vmem:[%s5586_s8 + $0x5e0] ss:$44 sps:$4 sm:$0xff]   ;;  %v5094_v35 = vld [vmem:[%s5586_s8 + $0x5f8] ss:$44 sps:$4 sm:$0xff]  }
 0x126   : > { %3018 = vmatprep.subr.bf16.mxu1 %v958_v38  ;;  %v5099_v38 = vld [vmem:[%s5586_s8 + $0x638] ss:$44 sps:$4 sm:$0xff]  }
 0x129   : > { %3019 = vmatpush1.bf16.msra.mxu1 %v957_v45  ;;  %v5109_v45 = vld [vmem:[%s5586_s8 + $0x704] ss:$44 sps:$4 sm:$0xff]  }
 0x12a   : > { %3020 = vmatprep.subr.bf16.mxu1 %v960_v48  ;;  %v5115_v48 = vld [vmem:[%s5586_s8 + $0x14] ss:$44 sps:$4 sm:$0xff]  }
 0x12b   : > { %2852 = vmatmul.mubr.bf16.gmra.mrb[28].mxu1 %v5033_v53  ;;  %v5119_v53 = vld [vmem:[%s5586_s8 + $0x68] ss:$44 sps:$4 sm:$0xff]  }
 0x12c   : > { %3581 = vmatmul.mubr.bf16.gmra.mrb[28].mxu0 %v5034_v54  ;;  %2861 = vmatprep.mubr.bf16.mxu1 %v5035_v55  ;;  %v5120_v54 = vld [vmem:[%s5586_s8 + $0x80] ss:$44 sps:$4 sm:$0xff]   ;;  %v5121_v55 = vld [vmem:[%s5586_s8 + $0xc4] ss:$44 sps:$4 sm:$0xff]  }
 0x12d   : > { %3590 = vmatprep.mubr.bf16.mxu0 %v5037_v56  ;;  %3021 = vmatpush1.bf16.msra.mxu1 %v959_v57  ;;  %v5123_v56 = vld [vmem:[%s5586_s8 + $0xc0] ss:$44 sps:$4 sm:$0xff]   ;;  %v5124_v57 = vld [vmem:[%s5586_s8 + $0xd8] ss:$44 sps:$4 sm:$0xff]  }
 0x12e   : > { %3022 = vmatprep.subr.bf16.mxu1 %v962_v60  ;;  %v5128_v60 = vld [vmem:[%s5586_s8 + $0x130] ss:$44 sps:$4 sm:$0xff]  }
 0x131   : > { %3023 = vmatpush1.bf16.msra.mxu1 %v961_v61  ;;  %v5129_v61 = vld [vmem:[%s5586_s8 + $0x174] ss:$44 sps:$4 sm:$0xff]  }
 0x133   : > { %2862 = vmatmul.mubr.bf16.gmra.mrb[32].mxu1 %v5039_v62  ;;  %v5131_v62 = vld [vmem:[%s5586_s8 + $0x170] ss:$44 sps:$4 sm:$0xff]  }
 0x134   : > { %3591 = vmatmul.mubr.bf16.gmra.mrb[32].mxu0 %v5040_v63  ;;  %2871 = vmatprep.mubr.bf16.mxu1 %v5041_v0  ;;  %v5132_v63 = vld [vmem:[%s5586_s8 + $0x188] ss:$44 sps:$4 sm:$0xff]   ;;  %v5133_v0 = vld [vmem:[%s5586_s8 + $0x1cc] ss:$44 sps:$4 sm:$0xff]  }
 0x135   : > { %3600 = vmatprep.mubr.bf16.mxu0 %v5043_v1  ;;  %v5135_v1 = vld [vmem:[%s5586_s8 + $0x1c8] ss:$44 sps:$4 sm:$0xff]  }
 0x13b   : > { %2872 = vmatmul.mubr.bf16.gmra.mrb[36].mxu1 %v5045_v2  ;;  %v5136_v2 = vld [vmem:[%s5586_s8 + $0x1e0] ss:$44 sps:$4 sm:$0xff]  }
 0x13c   : > { %3601 = vmatmul.mubr.bf16.gmra.mrb[36].mxu0 %v5046_v3  ;;  %2881 = vmatprep.mubr.bf16.mxu1 %v5047_v4  ;;  %v5137_v3 = vld [vmem:[%s5586_s8 + $0x224] ss:$44 sps:$4 sm:$0xff]   ;;  %v5139_v4 = vld [vmem:[%s5586_s8 + $0x220] ss:$44 sps:$4 sm:$0xff]  }
 0x13d   : > { %3610 = vmatprep.mubr.bf16.mxu0 %v5049_v5  ;;  %v5140_v5 = vld [vmem:[%s5586_s8 + $0x238] ss:$44 sps:$4 sm:$0xff]  }
 0x143   : > { %2882 = vmatmul.mubr.bf16.gmra.mrb[40].mxu1 %v5051_v6  ;;  %v5141_v6 = vld [vmem:[%s5586_s8 + $0x27c] ss:$44 sps:$4 sm:$0xff]  }
 0x144   : > { %3611 = vmatmul.mubr.bf16.gmra.mrb[40].mxu0 %v5052_v7  ;;  %2891 = vmatprep.mubr.bf16.mxu1 %v5053_v8  ;;  %v5143_v7 = vld [vmem:[%s5586_s8 + $0x278] ss:$44 sps:$4 sm:$0xff]   ;;  %v5144_v8 = vld [vmem:[%s5586_s8 + $0x290] ss:$44 sps:$4 sm:$0xff]  }
 0x145   : > { %3620 = vmatprep.mubr.bf16.mxu0 %v5055_v9  ;;  %v5145_v9 = vld [vmem:[%s5586_s8 + $0x2d4] ss:$44 sps:$4 sm:$0xff]  }
 0x14b   : > { %2892 = vmatmul.mubr.bf16.gmra.mrb[44].mxu1 %v5057_v10  ;;  %v5147_v10 = vld [vmem:[%s5586_s8 + $0x2d0] ss:$44 sps:$4 sm:$0xff]  }
 0x14c   : > { %3621 = vmatmul.mubr.bf16.gmra.mrb[44].mxu0 %v5058_v11  ;;  %2901 = vmatprep.mubr.bf16.mxu1 %v5059_v12  ;;  %v5148_v11 = vld [vmem:[%s5586_s8 + $0x2e8] ss:$44 sps:$4 sm:$0xff]   ;;  %v5149_v12 = vld [vmem:[%s5586_s8 + $0x32c] ss:$44 sps:$4 sm:$0xff]  }
 0x14d   : > { %3630 = vmatprep.mubr.bf16.mxu0 %v5061_v13  ;;  %v5151_v13 = vld [vmem:[%s5586_s8 + $0x328] ss:$44 sps:$4 sm:$0xff]  }
 0x153   : > { %2902 = vmatmul.mubr.bf16.gmra.mrb[48].mxu1 %v5063_v14  ;;  %v5152_v14 = vld [vmem:[%s5586_s8 + $0x340] ss:$44 sps:$4 sm:$0xff]  }
 0x154   : > { %3631 = vmatmul.mubr.bf16.gmra.mrb[48].mxu0 %v5064_v15  ;;  %2911 = vmatprep.mubr.bf16.mxu1 %v5065_v16  ;;  %v5153_v15 = vld [vmem:[%s5586_s8 + $0x384] ss:$44 sps:$4 sm:$0xff]   ;;  %v5155_v16 = vld [vmem:[%s5586_s8 + $0x380] ss:$44 sps:$4 sm:$0xff]  }
 0x155   : > { %3640 = vmatprep.mubr.bf16.mxu0 %v5067_v17  ;;  %v5156_v17 = vld [vmem:[%s5586_s8 + $0x398] ss:$44 sps:$4 sm:$0xff]  }
 0x15b   : > { %2912 = vmatmul.mubr.bf16.gmra.mrb[52].mxu1 %v5069_v18  ;;  %v5157_v18 = vld [vmem:[%s5586_s8 + $0x3dc] ss:$44 sps:$4 sm:$0xff]  }
 0x15c   : > { %3641 = vmatmul.mubr.bf16.gmra.mrb[52].mxu0 %v5070_v19  ;;  %2921 = vmatprep.mubr.bf16.mxu1 %v5071_v20  ;;  %v5159_v19 = vld [vmem:[%s5586_s8 + $0x3d8] ss:$44 sps:$4 sm:$0xff]   ;;  %v5160_v20 = vld [vmem:[%s5586_s8 + $0x3f0] ss:$44 sps:$4 sm:$0xff]  }
 0x15d   : > { %3650 = vmatprep.mubr.bf16.mxu0 %v5073_v21  ;;  %v5161_v21 = vld [vmem:[%s5586_s8 + $0x434] ss:$44 sps:$4 sm:$0xff]  }
 0x163   : > { %2922 = vmatmul.mubr.bf16.gmra.mrb[56].mxu1 %v5075_v22  ;;  %v5163_v22 = vld [vmem:[%s5586_s8 + $0x430] ss:$44 sps:$4 sm:$0xff]  }
 0x164   : > { %3651 = vmatmul.mubr.bf16.gmra.mrb[56].mxu0 %v5076_v23  ;;  %2931 = vmatprep.mubr.bf16.mxu1 %v5077_v24  ;;  %v5164_v23 = vld [vmem:[%s5586_s8 + $0x448] ss:$44 sps:$4 sm:$0xff]   ;;  %v5165_v24 = vld [vmem:[%s5586_s8 + $0x48c] ss:$44 sps:$4 sm:$0xff]  }
 0x165   : > { %3660 = vmatprep.mubr.bf16.mxu0 %v5079_v25  ;;  %v5167_v25 = vld [vmem:[%s5586_s8 + $0x488] ss:$44 sps:$4 sm:$0xff]  }
 0x16b   : > { %2932 = vmatmul.mubr.bf16.gmra.mrb[60].mxu1 %v5081_v26  ;;  %v5168_v26 = vld [vmem:[%s5586_s8 + $0x4a0] ss:$44 sps:$4 sm:$0xff]  }
 0x16c   : > { %3661 = vmatmul.mubr.bf16.gmra.mrb[60].mxu0 %v5082_v27  ;;  %2941 = vmatprep.mubr.bf16.mxu1 %v5083_v28  ;;  %v5169_v27 = vld [vmem:[%s5586_s8 + $0x4e4] ss:$44 sps:$4 sm:$0xff]   ;;  %v5171_v28 = vld [vmem:[%s5586_s8 + $0x4e0] ss:$44 sps:$4 sm:$0xff]  }
 0x16d   : > { %3670 = vmatprep.mubr.bf16.mxu0 %v5085_v29  ;;  %v5172_v29 = vld [vmem:[%s5586_s8 + $0x4f8] ss:$44 sps:$4 sm:$0xff]  }
 0x173   : > { %2942 = vmatmul.mubr.bf16.gmra.mrb[64].mxu1 %v5087_v30  ;;  %v5173_v30 = vld [vmem:[%s5586_s8 + $0x53c] ss:$44 sps:$4 sm:$0xff]  }
 0x174   : > { %3671 = vmatmul.mubr.bf16.gmra.mrb[64].mxu0 %v5088_v31  ;;  %2951 = vmatprep.mubr.bf16.mxu1 %v5089_v32  ;;  %v5175_v31 = vld [vmem:[%s5586_s8 + $0x538] ss:$44 sps:$4 sm:$0xff]   ;;  %v5176_v32 = vld [vmem:[%s5586_s8 + $0x550] ss:$44 sps:$4 sm:$0xff]  }
 0x175   : > { %3680 = vmatprep.mubr.bf16.mxu0 %v5091_v33  ;;  %v5177_v33 = vld [vmem:[%s5586_s8 + $0x594] ss:$44 sps:$4 sm:$0xff]  }
 0x17b   : > { %2952 = vmatmul.mubr.bf16.gmra.mrb[68].mxu1 %v5093_v34  ;;  %v5179_v34 = vld [vmem:[%s5586_s8 + $0x590] ss:$44 sps:$4 sm:$0xff]  }
 0x17c   : > { %3681 = vmatmul.mubr.bf16.gmra.mrb[68].mxu0 %v5094_v35  ;;  %2961 = vmatprep.mubr.bf16.mxu1 %v5095_v36  ;;  %v5180_v35 = vld [vmem:[%s5586_s8 + $0x5a8] ss:$44 sps:$4 sm:$0xff]   ;;  %v5181_v36 = vld [vmem:[%s5586_s8 + $0x5ec] ss:$44 sps:$4 sm:$0xff]  }
 0x17d   : > { %3690 = vmatprep.mubr.bf16.mxu0 %v5097_v37  ;;  %v5183_v37 = vld [vmem:[%s5586_s8 + $0x5e8] ss:$44 sps:$4 sm:$0xff]  }
 0x183   : > { %2962 = vmatmul.mubr.bf16.gmra.mrb[72].mxu1 %v5099_v38  ;;  %v5184_v38 = vld [vmem:[%s5586_s8 + $0x600] ss:$44 sps:$4 sm:$0xff]  }
 0x184   : > { %3691 = vmatmul.mubr.bf16.gmra.mrb[72].mxu0 %v5100_v39  ;;  %2971 = vmatprep.mubr.bf16.mxu1 %v5101_v40  ;;  %v5185_v39 = vld [vmem:[%s5586_s8 + $0x644] ss:$44 sps:$4 sm:$0xff]   ;;  %v5187_v40 = vld [vmem:[%s5586_s8 + $0x640] ss:$44 sps:$4 sm:$0xff]  }
 0x185   : > { %3700 = vmatprep.mubr.bf16.mxu0 %v5103_v41  ;;  %v5188_v41 = vld [vmem:[%s5586_s8 + $0x658] ss:$44 sps:$4 sm:$0xff]  }
 0x18b   : > { %2972 = vmatmul.mubr.bf16.gmra.mrb[76].mxu1 %v5105_v42  ;;  %v5189_v42 = vld [vmem:[%s5586_s8 + $0x69c] ss:$44 sps:$4 sm:$0xff]  }
 0x18c   : > { %3701 = vmatmul.mubr.bf16.gmra.mrb[76].mxu0 %v5106_v43  ;;  %2981 = vmatprep.mubr.bf16.mxu1 %v5107_v44  ;;  %v5191_v43 = vld [vmem:[%s5586_s8 + $0x698] ss:$44 sps:$4 sm:$0xff]   ;;  %v5192_v44 = vld [vmem:[%s5586_s8 + $0x6b0] ss:$44 sps:$4 sm:$0xff]  }
 0x18d   : > { %3710 = vmatprep.mubr.bf16.mxu0 %v5109_v45  ;;  %v5193_v45 = vld [vmem:[%s5586_s8 + $0x6f4] ss:$44 sps:$4 sm:$0xff]  }
 0x193   : > { %2982 = vmatmul.mubr.bf16.gmra.mrb[80].mxu1 %v5111_v46  ;;  %v5195_v46 = vld [vmem:[%s5586_s8 + $0x6f0] ss:$44 sps:$4 sm:$0xff]  }
 0x194   : > { %3711 = vmatmul.mubr.bf16.gmra.mrb[80].mxu0 %v5112_v47  ;;  %3024 = vmatprep.mubr.bf16.mxu1 %v5115_v48  ;;  %v5196_v47 = vld [vmem:[%s5586_s8 + $0x708] ss:$44 sps:$4 sm:$0xff]  }
 0x195   : > { %3753 = vmatprep.mubr.bf16.mxu0 %v5221_v49 }
 0x19b   : > { %3025 = vmatmul.mubr.bf16.vlgmr.msra.gmra.mrb[0].mxu1 %v5113_v50 }
 0x19c   : > { %4391 = vmatmul.mubr.msk.bf16.vlgmr.msra.gmra.mrb[0].mxu0 %vm2442_vm0, %v5116_v51  ;;  %3034 = vmatprep.mubr.bf16.mxu1 %v5117_v52 }
 0x19d   : > { %3763 = vmatprep.mubr.bf16.mxu0 %v5221_v49 }
 0x1a3   : > { %3035 = vmatmul.mubr.bf16.gmra.mrb[4].mxu1 %v5119_v53 }
 0x1a4   : > { %4392 = vmatmul.mubr.msk.bf16.gmra.mrb[4].mxu0 %vm2442_vm0, %v5120_v54  ;;  %3044 = vmatprep.mubr.bf16.mxu1 %v5121_v55 }
 0x1a5   : > { %3773 = vmatprep.mubr.bf16.mxu0 %v5221_v49 }
 0x1ab   : > { %3045 = vmatmul.mubr.bf16.gmra.mrb[8].mxu1 %v5123_v56 }
 0x1ac   : > { %4393 = vmatmul.mubr.msk.bf16.gmra.mrb[8].mxu0 %vm2442_vm0, %v5124_v57  ;;  %3054 = vmatprep.mubr.bf16.mxu1 %v5125_v58 }
 0x1ad   : > { %3783 = vmatprep.mubr.bf16.mxu0 %v5221_v49 }
 0x1b3   : > { %3055 = vmatmul.mubr.bf16.gmra.mrb[12].mxu1 %v5127_v59 }
 0x1b4   : > { %4394 = vmatmul.mubr.msk.bf16.gmra.mrb[12].mxu0 %vm2442_vm0, %v5128_v60  ;;  %3064 = vmatprep.mubr.bf16.mxu1 %v5129_v61 }
 0x1b5   : > { %3793 = vmatprep.mubr.bf16.mxu0 %v5221_v49 }
 0x1bb   : > { %3065 = vmatmul.mubr.bf16.gmra.mrb[16].mxu1 %v5131_v62 }
 0x1bc   : > { %4395 = vmatmul.mubr.msk.bf16.gmra.mrb[16].mxu0 %vm2442_vm0, %v5132_v63  ;;  %3074 = vmatprep.mubr.bf16.mxu1 %v5133_v0 }
 0x1bd   : > { %3803 = vmatprep.mubr.bf16.mxu0 %v5221_v49 }
 0x1c3   : > { %3075 = vmatmul.mubr.bf16.gmra.mrb[20].mxu1 %v5135_v1 }
 0x1c4   : > { %4396 = vmatmul.mubr.msk.bf16.gmra.mrb[20].mxu0 %vm2442_vm0, %v5136_v2  ;;  %3084 = vmatprep.mubr.bf16.mxu1 %v5137_v3 }
 0x1c5   : > { %3813 = vmatprep.mubr.bf16.mxu0 %v5221_v49 }
 0x1cb   : > { %3085 = vmatmul.mubr.bf16.gmra.mrb[24].mxu1 %v5139_v4 }
 0x1cc   : > { %4397 = vmatmul.mubr.msk.bf16.gmra.mrb[24].mxu0 %vm2442_vm0, %v5140_v5  ;;  %3094 = vmatprep.mubr.bf16.mxu1 %v5141_v6 }
 0x1cd   : > { %3823 = vmatprep.mubr.bf16.mxu0 %v5221_v49 }
 0x1d3   : > { %3095 = vmatmul.mubr.bf16.gmra.mrb[28].mxu1 %v5143_v7 }
 0x1d4   : > { %4398 = vmatmul.mubr.msk.bf16.gmra.mrb[28].mxu0 %vm2442_vm0, %v5144_v8  ;;  %3104 = vmatprep.mubr.bf16.mxu1 %v5145_v9 }
 0x1d5   : > { %3833 = vmatprep.mubr.bf16.mxu0 %v5221_v49 }
 0x1db   : > { %3105 = vmatmul.mubr.bf16.gmra.mrb[32].mxu1 %v5147_v10 }
 0x1dc   : > { %4399 = vmatmul.mubr.msk.bf16.gmra.mrb[32].mxu0 %vm2442_vm0, %v5148_v11  ;;  %3114 = vmatprep.mubr.bf16.mxu1 %v5149_v12 }
 0x1dd   : > { %3843 = vmatprep.mubr.bf16.mxu0 %v5221_v49 }
 0x1e3   : > { %3115 = vmatmul.mubr.bf16.gmra.mrb[36].mxu1 %v5151_v13 }
 0x1e4   : > { %4400 = vmatmul.mubr.msk.bf16.gmra.mrb[36].mxu0 %vm2442_vm0, %v5152_v14  ;;  %3124 = vmatprep.mubr.bf16.mxu1 %v5153_v15 }
 0x1e5   : > { %3853 = vmatprep.mubr.bf16.mxu0 %v5221_v49 }
 0x1eb   : > { %3125 = vmatmul.mubr.bf16.gmra.mrb[40].mxu1 %v5155_v16 }
 0x1ec   : > { %4401 = vmatmul.mubr.msk.bf16.gmra.mrb[40].mxu0 %vm2442_vm0, %v5156_v17  ;;  %3134 = vmatprep.mubr.bf16.mxu1 %v5157_v18 }
 0x1ed   : > { %3863 = vmatprep.mubr.bf16.mxu0 %v5221_v49 }
 0x1f3   : > { %3135 = vmatmul.mubr.bf16.gmra.mrb[44].mxu1 %v5159_v19 }
 0x1f4   : > { %4402 = vmatmul.mubr.msk.bf16.gmra.mrb[44].mxu0 %vm2442_vm0, %v5160_v20  ;;  %3144 = vmatprep.mubr.bf16.mxu1 %v5161_v21 }
 0x1f5   : > { %3873 = vmatprep.mubr.bf16.mxu0 %v5221_v49 }
 0x1fb   : > { %3145 = vmatmul.mubr.bf16.gmra.mrb[48].mxu1 %v5163_v22 }
 0x1fc   : > { %4403 = vmatmul.mubr.msk.bf16.gmra.mrb[48].mxu0 %vm2442_vm0, %v5164_v23  ;;  %3154 = vmatprep.mubr.bf16.mxu1 %v5165_v24 }
 0x1fd   : > { %3883 = vmatprep.mubr.bf16.mxu0 %v5221_v49 }
 0x203   : > { %3155 = vmatmul.mubr.bf16.gmra.mrb[52].mxu1 %v5167_v25 }
 0x204   : > { %4404 = vmatmul.mubr.msk.bf16.gmra.mrb[52].mxu0 %vm2442_vm0, %v5168_v26  ;;  %3164 = vmatprep.mubr.bf16.mxu1 %v5169_v27 }
 0x205   : > { %3893 = vmatprep.mubr.bf16.mxu0 %v5221_v49 }
 0x20b   : > { %3165 = vmatmul.mubr.bf16.gmra.mrb[56].mxu1 %v5171_v28 }
 0x20c   : > { %4405 = vmatmul.mubr.msk.bf16.gmra.mrb[56].mxu0 %vm2442_vm0, %v5172_v29  ;;  %3174 = vmatprep.mubr.bf16.mxu1 %v5173_v30 }
 0x20d   : > { %3903 = vmatprep.mubr.bf16.mxu0 %v5221_v49 }
 0x213   : > { %3175 = vmatmul.mubr.bf16.gmra.mrb[60].mxu1 %v5175_v31 }
 0x214   : > { %4406 = vmatmul.mubr.msk.bf16.gmra.mrb[60].mxu0 %vm2442_vm0, %v5176_v32  ;;  %3184 = vmatprep.mubr.bf16.mxu1 %v5177_v33 }
 0x215   : > { %3913 = vmatprep.mubr.bf16.mxu0 %v5221_v49 }
 0x21b   : > { %3185 = vmatmul.mubr.bf16.gmra.mrb[64].mxu1 %v5179_v34 }
 0x21c   : > { %4407 = vmatmul.mubr.msk.bf16.gmra.mrb[64].mxu0 %vm2442_vm0, %v5180_v35  ;;  %3194 = vmatprep.mubr.bf16.mxu1 %v5181_v36 }
 0x21d   : > { %3923 = vmatprep.mubr.bf16.mxu0 %v5221_v49 }
 0x223   : > { %3195 = vmatmul.mubr.bf16.gmra.mrb[68].mxu1 %v5183_v37 }
 0x224   : > { %4408 = vmatmul.mubr.msk.bf16.gmra.mrb[68].mxu0 %vm2442_vm0, %v5184_v38  ;;  %3204 = vmatprep.mubr.bf16.mxu1 %v5185_v39 }
 0x225   : > { %3933 = vmatprep.mubr.bf16.mxu0 %v5221_v49 }
 0x22b   : > { %3205 = vmatmul.mubr.bf16.gmra.mrb[72].mxu1 %v5187_v40 }
 0x22c   : > { %4409 = vmatmul.mubr.msk.bf16.gmra.mrb[72].mxu0 %vm2442_vm0, %v5188_v41  ;;  %3214 = vmatprep.mubr.bf16.mxu1 %v5189_v42 }
 0x22d   : > { %3943 = vmatprep.mubr.bf16.mxu0 %v5221_v49 }
 0x233   : > { %3215 = vmatmul.mubr.bf16.gmra.mrb[76].mxu1 %v5191_v43 }
 0x234   : > { %4410 = vmatmul.mubr.msk.bf16.gmra.mrb[76].mxu0 %vm2442_vm0, %v5192_v44  ;;  %3224 = vmatprep.mubr.bf16.mxu1 %v5193_v45 }
 0x235   : > { %3953 = vmatprep.mubr.bf16.mxu0 %v5221_v49 }
 0x23b   : > { %3225 = vmatmul.mubr.bf16.gmra.mrb[80].mxu1 %v5195_v46 }
 0x23c   : > { %4411 = vmatmul.mubr.msk.bf16.gmra.mrb[80].mxu0 %vm2442_vm0, %v5196_v47 }
 0x26e   : > { %v3026_v48 = vpop.f32.mrb[0].mxu1 }
 0x26f   : > { %v3755_v50 = vpop.f32.mrb[0].mxu0  ;;  %v3028_v51 = vpop.f32.mrb[1].mxu1 }
 0x270   : > { %v4415_v52 = vadd.f32 %v3755_v50, %v3026_v48  ;;  %v3757_v49 = vpop.f32.mrb[1].mxu0  ;;  %v3030_v53 = vpop.f32.mrb[2].mxu1 }
 0x271   : > { %v4416_v54 = vadd.f32 %v3757_v49, %v3028_v51  ;;  %v3759_v55 = vpop.f32.mrb[2].mxu0  ;;  %v3032_v56 = vpop.f32.mrb[3].mxu1 }
 0x272   : > { %3964 = vst [vmem:[%s6561_s19] sm:$0xff] %v4415_v52  ;;  %v4417_v57 = vadd.f32 %v3759_v55, %v3030_v53  ;;  %v3761_v58 = vpop.f32.mrb[3].mxu0 }
 0x273   : > { %3966 = vst.msk [vmem:[%s6561_s19 + $0x8] sm:$0xff] %vm3965_vm1, %v4416_v54  ;;  %v4418_v59 = vadd.f32 %v3761_v58, %v3032_v56 }
 0x274   : > { %3967 = vst [vmem:[%s6561_s19 + $0x10] sm:$0xff] %v4417_v57 }
 0x275   : > { %3968 = vst.msk [vmem:[%s6561_s19 + $0x18] sm:$0xff] %vm3965_vm1, %v4418_v59 }
 0x276   : > { %v3036_v60 = vpop.f32.mrb[4].mxu1 }
 0x277   : > { %v3765_v61 = vpop.f32.mrb[4].mxu0  ;;  %v3038_v62 = vpop.f32.mrb[5].mxu1 }
 0x278   : > { %v4419_v63 = vadd.f32 %v3765_v61, %v3036_v60  ;;  %v3767_v0 = vpop.f32.mrb[5].mxu0  ;;  %v3040_v1 = vpop.f32.mrb[6].mxu1 }
 0x279   : > { %v4420_v2 = vadd.f32 %v3767_v0, %v3038_v62  ;;  %v3769_v3 = vpop.f32.mrb[6].mxu0  ;;  %v3042_v4 = vpop.f32.mrb[7].mxu1 }
 0x27a   : > { %3969 = vst [vmem:[%s6561_s19 + $0x20] sm:$0xff] %v4419_v63  ;;  %v4421_v5 = vadd.f32 %v3769_v3, %v3040_v1  ;;  %v3771_v6 = vpop.f32.mrb[7].mxu0 }
 0x27b   : > { %3970 = vst.msk [vmem:[%s6561_s19 + $0x28] sm:$0xff] %vm3965_vm1, %v4420_v2  ;;  %v4422_v7 = vadd.f32 %v3771_v6, %v3042_v4 }
 0x27c   : > { %3971 = vst [vmem:[%s6561_s19 + $0x30] sm:$0xff] %v4421_v5 }
 0x27d   : > { %3972 = vst.msk [vmem:[%s6561_s19 + $0x38] sm:$0xff] %vm3965_vm1, %v4422_v7 }
 0x27e   : > { %v3046_v8 = vpop.f32.mrb[8].mxu1 }
 0x27f   : > { %v3775_v9 = vpop.f32.mrb[8].mxu0  ;;  %v3048_v10 = vpop.f32.mrb[9].mxu1 }
 0x280   : > { %v4423_v11 = vadd.f32 %v3775_v9, %v3046_v8  ;;  %v3777_v12 = vpop.f32.mrb[9].mxu0  ;;  %v3050_v13 = vpop.f32.mrb[10].mxu1 }
 0x281   : > { %v4424_v14 = vadd.f32 %v3777_v12, %v3048_v10  ;;  %v3779_v15 = vpop.f32.mrb[10].mxu0  ;;  %v3052_v16 = vpop.f32.mrb[11].mxu1 }
 0x282   : > { %3973 = vst [vmem:[%s6561_s19 + $0x40] sm:$0xff] %v4423_v11  ;;  %v4425_v17 = vadd.f32 %v3779_v15, %v3050_v13  ;;  %v3781_v18 = vpop.f32.mrb[11].mxu0 }
 0x283   : > { %3974 = vst.msk [vmem:[%s6561_s19 + $0x48] sm:$0xff] %vm3965_vm1, %v4424_v14  ;;  %v4426_v19 = vadd.f32 %v3781_v18, %v3052_v16 }
 0x284   : > { %3975 = vst [vmem:[%s6561_s19 + $0x50] sm:$0xff] %v4425_v17 }
 0x285   : > { %3976 = vst.msk [vmem:[%s6561_s19 + $0x58] sm:$0xff] %vm3965_vm1, %v4426_v19 }
 0x286   : > { %v3056_v20 = vpop.f32.mrb[12].mxu1 }
 0x287   : > { %v3785_v21 = vpop.f32.mrb[12].mxu0  ;;  %v3058_v22 = vpop.f32.mrb[13].mxu1 }
 0x288   : > { %v4427_v23 = vadd.f32 %v3785_v21, %v3056_v20  ;;  %v3787_v24 = vpop.f32.mrb[13].mxu0  ;;  %v3060_v25 = vpop.f32.mrb[14].mxu1 }
 0x289   : > { %v4428_v26 = vadd.f32 %v3787_v24, %v3058_v22  ;;  %v3789_v27 = vpop.f32.mrb[14].mxu0  ;;  %v3062_v28 = vpop.f32.mrb[15].mxu1 }
 0x28a   : > { %3977 = vst [vmem:[%s6561_s19 + $0x60] sm:$0xff] %v4427_v23  ;;  %v4429_v29 = vadd.f32 %v3789_v27, %v3060_v25  ;;  %v3791_v30 = vpop.f32.mrb[15].mxu0 }
 0x28b   : > { %3978 = vst.msk [vmem:[%s6561_s19 + $0x68] sm:$0xff] %vm3965_vm1, %v4428_v26  ;;  %v4430_v31 = vadd.f32 %v3791_v30, %v3062_v28 }
 0x28c   : > { %3979 = vst [vmem:[%s6561_s19 + $0x70] sm:$0xff] %v4429_v29 }
 0x28d   : > { %3980 = vst.msk [vmem:[%s6561_s19 + $0x78] sm:$0xff] %vm3965_vm1, %v4430_v31 }
 0x28e   : > { %v3066_v32 = vpop.f32.mrb[16].mxu1 }
 0x28f   : > { %v3795_v33 = vpop.f32.mrb[16].mxu0  ;;  %v3068_v34 = vpop.f32.mrb[17].mxu1 }
 0x290   : > { %v4431_v35 = vadd.f32 %v3795_v33, %v3066_v32  ;;  %v3797_v36 = vpop.f32.mrb[17].mxu0  ;;  %v3070_v37 = vpop.f32.mrb[18].mxu1 }
 0x291   : > { %v4432_v38 = vadd.f32 %v3797_v36, %v3068_v34  ;;  %v3799_v39 = vpop.f32.mrb[18].mxu0  ;;  %v3072_v40 = vpop.f32.mrb[19].mxu1 }
 0x292   : > { %3981 = vst [vmem:[%s6561_s19 + $0x80] sm:$0xff] %v4431_v35  ;;  %v4433_v41 = vadd.f32 %v3799_v39, %v3070_v37  ;;  %v3801_v42 = vpop.f32.mrb[19].mxu0 }
 0x293   : > { %3982 = vst.msk [vmem:[%s6561_s19 + $0x88] sm:$0xff] %vm3965_vm1, %v4432_v38  ;;  %v4434_v43 = vadd.f32 %v3801_v42, %v3072_v40 }
 0x294   : > { %3983 = vst [vmem:[%s6561_s19 + $0x90] sm:$0xff] %v4433_v41 }
 0x295   : > { %3984 = vst.msk [vmem:[%s6561_s19 + $0x98] sm:$0xff] %vm3965_vm1, %v4434_v43 }
 0x296   : > { %v3076_v44 = vpop.f32.mrb[20].mxu1 }
 0x297   : > { %v3805_v45 = vpop.f32.mrb[20].mxu0  ;;  %v3078_v46 = vpop.f32.mrb[21].mxu1 }
 0x298   : > { %v4435_v47 = vadd.f32 %v3805_v45, %v3076_v44  ;;  %v3807_v48 = vpop.f32.mrb[21].mxu0  ;;  %v3080_v50 = vpop.f32.mrb[22].mxu1 }
 0x299   : > { %v4436_v51 = vadd.f32 %v3807_v48, %v3078_v46  ;;  %v3809_v52 = vpop.f32.mrb[22].mxu0  ;;  %v3082_v49 = vpop.f32.mrb[23].mxu1 }
 0x29a   : > { %3985 = vst [vmem:[%s6561_s19 + $0xa0] sm:$0xff] %v4435_v47  ;;  %v4437_v53 = vadd.f32 %v3809_v52, %v3080_v50  ;;  %v3811_v54 = vpop.f32.mrb[23].mxu0 }
 0x29b   : > { %3986 = vst.msk [vmem:[%s6561_s19 + $0xa8] sm:$0xff] %vm3965_vm1, %v4436_v51  ;;  %v4438_v55 = vadd.f32 %v3811_v54, %v3082_v49 }
 0x29c   : > { %3987 = vst [vmem:[%s6561_s19 + $0xb0] sm:$0xff] %v4437_v53 }
 0x29d   : > { %3988 = vst.msk [vmem:[%s6561_s19 + $0xb8] sm:$0xff] %vm3965_vm1, %v4438_v55 }
 0x29e   : > { %v3086_v56 = vpop.f32.mrb[24].mxu1 }
 0x29f   : > { %v3815_v57 = vpop.f32.mrb[24].mxu0  ;;  %v3088_v58 = vpop.f32.mrb[25].mxu1 }
 0x2a0   : > { %v4439_v59 = vadd.f32 %v3815_v57, %v3086_v56  ;;  %v3817_v60 = vpop.f32.mrb[25].mxu0  ;;  %v3090_v61 = vpop.f32.mrb[26].mxu1 }
 0x2a1   : > { %v4440_v62 = vadd.f32 %v3817_v60, %v3088_v58  ;;  %v3819_v63 = vpop.f32.mrb[26].mxu0  ;;  %v3092_v0 = vpop.f32.mrb[27].mxu1 }
 0x2a2   : > { %3989 = vst [vmem:[%s6561_s19 + $0xc0] sm:$0xff] %v4439_v59  ;;  %v4441_v1 = vadd.f32 %v3819_v63, %v3090_v61  ;;  %v3821_v2 = vpop.f32.mrb[27].mxu0 }
 0x2a3   : > { %3990 = vst.msk [vmem:[%s6561_s19 + $0xc8] sm:$0xff] %vm3965_vm1, %v4440_v62  ;;  %v4442_v3 = vadd.f32 %v3821_v2, %v3092_v0 }
 0x2a4   : > { %3991 = vst [vmem:[%s6561_s19 + $0xd0] sm:$0xff] %v4441_v1 }
 0x2a5   : > { %3992 = vst.msk [vmem:[%s6561_s19 + $0xd8] sm:$0xff] %vm3965_vm1, %v4442_v3 }
 0x2a6   : > { %v3096_v4 = vpop.f32.mrb[28].mxu1 }
 0x2a7   : > { %v3825_v5 = vpop.f32.mrb[28].mxu0  ;;  %v3098_v6 = vpop.f32.mrb[29].mxu1 }
 0x2a8   : > { %v4443_v7 = vadd.f32 %v3825_v5, %v3096_v4  ;;  %v3827_v8 = vpop.f32.mrb[29].mxu0  ;;  %v3100_v9 = vpop.f32.mrb[30].mxu1 }
 0x2a9   : > { %v4444_v10 = vadd.f32 %v3827_v8, %v3098_v6  ;;  %v3829_v11 = vpop.f32.mrb[30].mxu0  ;;  %v3102_v12 = vpop.f32.mrb[31].mxu1 }
 0x2aa   : > { %3993 = vst [vmem:[%s6561_s19 + $0xe0] sm:$0xff] %v4443_v7  ;;  %v4445_v13 = vadd.f32 %v3829_v11, %v3100_v9  ;;  %v3831_v14 = vpop.f32.mrb[31].mxu0 }
 0x2ab   : > { %3994 = vst.msk [vmem:[%s6561_s19 + $0xe8] sm:$0xff] %vm3965_vm1, %v4444_v10  ;;  %v4446_v15 = vadd.f32 %v3831_v14, %v3102_v12 }
 0x2ac   : > { %3995 = vst [vmem:[%s6561_s19 + $0xf0] sm:$0xff] %v4445_v13 }
 0x2ad   : > { %3996 = vst.msk [vmem:[%s6561_s19 + $0xf8] sm:$0xff] %vm3965_vm1, %v4446_v15 }
 0x2ae   : > { %v3106_v16 = vpop.f32.mrb[32].mxu1 }
 0x2af   : > { %v3835_v17 = vpop.f32.mrb[32].mxu0  ;;  %v3108_v18 = vpop.f32.mrb[33].mxu1 }
 0x2b0   : > { %v4447_v19 = vadd.f32 %v3835_v17, %v3106_v16  ;;  %v3837_v20 = vpop.f32.mrb[33].mxu0  ;;  %v3110_v21 = vpop.f32.mrb[34].mxu1 }
 0x2b1   : > { %v4448_v22 = vadd.f32 %v3837_v20, %v3108_v18  ;;  %v3839_v23 = vpop.f32.mrb[34].mxu0  ;;  %v3112_v24 = vpop.f32.mrb[35].mxu1 }
 0x2b2   : > { %3997 = vst [vmem:[%s6561_s19 + $0x100] sm:$0xff] %v4447_v19  ;;  %v4449_v25 = vadd.f32 %v3839_v23, %v3110_v21  ;;  %v3841_v26 = vpop.f32.mrb[35].mxu0 }
 0x2b3   : > { %3998 = vst.msk [vmem:[%s6561_s19 + $0x108] sm:$0xff] %vm3965_vm1, %v4448_v22  ;;  %v4450_v27 = vadd.f32 %v3841_v26, %v3112_v24 }
 0x2b4   : > { %3999 = vst [vmem:[%s6561_s19 + $0x110] sm:$0xff] %v4449_v25 }
 0x2b5   : > { %4000 = vst.msk [vmem:[%s6561_s19 + $0x118] sm:$0xff] %vm3965_vm1, %v4450_v27 }
 0x2b6   : > { %v3116_v28 = vpop.f32.mrb[36].mxu1 }
 0x2b7   : > { %v3845_v29 = vpop.f32.mrb[36].mxu0  ;;  %v3118_v30 = vpop.f32.mrb[37].mxu1 }
 0x2b8   : > { %v4451_v31 = vadd.f32 %v3845_v29, %v3116_v28  ;;  %v3847_v32 = vpop.f32.mrb[37].mxu0  ;;  %v3120_v33 = vpop.f32.mrb[38].mxu1 }
 0x2b9   : > { %v4452_v34 = vadd.f32 %v3847_v32, %v3118_v30  ;;  %v3849_v35 = vpop.f32.mrb[38].mxu0  ;;  %v3122_v36 = vpop.f32.mrb[39].mxu1 }
 0x2ba   : > { %4001 = vst [vmem:[%s6561_s19 + $0x120] sm:$0xff] %v4451_v31  ;;  %v4453_v37 = vadd.f32 %v3849_v35, %v3120_v33  ;;  %v3851_v38 = vpop.f32.mrb[39].mxu0 }
 0x2bb   : > { %4002 = vst.msk [vmem:[%s6561_s19 + $0x128] sm:$0xff] %vm3965_vm1, %v4452_v34  ;;  %v4454_v39 = vadd.f32 %v3851_v38, %v3122_v36 }
 0x2bc   : > { %4003 = vst [vmem:[%s6561_s19 + $0x130] sm:$0xff] %v4453_v37 }
 0x2bd   : > { %4004 = vst.msk [vmem:[%s6561_s19 + $0x138] sm:$0xff] %vm3965_vm1, %v4454_v39 }
 0x2be   : > { %v3126_v40 = vpop.f32.mrb[40].mxu1 }
 0x2bf   : > { %v3855_v41 = vpop.f32.mrb[40].mxu0  ;;  %v3128_v42 = vpop.f32.mrb[41].mxu1 }
 0x2c0   : > { %v4455_v43 = vadd.f32 %v3855_v41, %v3126_v40  ;;  %v3857_v44 = vpop.f32.mrb[41].mxu0  ;;  %v3130_v45 = vpop.f32.mrb[42].mxu1 }
 0x2c1   : > { %v4456_v46 = vadd.f32 %v3857_v44, %v3128_v42  ;;  %v3859_v47 = vpop.f32.mrb[42].mxu0  ;;  %v3132_v48 = vpop.f32.mrb[43].mxu1 }
 0x2c2   : > { %4005 = vst [vmem:[%s6561_s19 + $0x140] sm:$0xff] %v4455_v43  ;;  %v4457_v50 = vadd.f32 %v3859_v47, %v3130_v45  ;;  %v3861_v51 = vpop.f32.mrb[43].mxu0 }
 0x2c3   : > { %4006 = vst.msk [vmem:[%s6561_s19 + $0x148] sm:$0xff] %vm3965_vm1, %v4456_v46  ;;  %v4458_v52 = vadd.f32 %v3861_v51, %v3132_v48 }
 0x2c4   : > { %4007 = vst [vmem:[%s6561_s19 + $0x150] sm:$0xff] %v4457_v50 }
 0x2c5   : > { %4008 = vst.msk [vmem:[%s6561_s19 + $0x158] sm:$0xff] %vm3965_vm1, %v4458_v52 }
 0x2c6   : > { %v3136_v49 = vpop.f32.mrb[44].mxu1 }
 0x2c7   : > { %v3865_v53 = vpop.f32.mrb[44].mxu0  ;;  %v3138_v54 = vpop.f32.mrb[45].mxu1 }
 0x2c8   : > { %v4459_v55 = vadd.f32 %v3865_v53, %v3136_v49  ;;  %v3867_v56 = vpop.f32.mrb[45].mxu0  ;;  %v3140_v57 = vpop.f32.mrb[46].mxu1 }
 0x2c9   : > { %v4460_v58 = vadd.f32 %v3867_v56, %v3138_v54  ;;  %v3869_v59 = vpop.f32.mrb[46].mxu0  ;;  %v3142_v60 = vpop.f32.mrb[47].mxu1 }
 0x2ca   : > { %4009 = vst [vmem:[%s6561_s19 + $0x160] sm:$0xff] %v4459_v55  ;;  %v4461_v61 = vadd.f32 %v3869_v59, %v3140_v57  ;;  %v3871_v62 = vpop.f32.mrb[47].mxu0 }
 0x2cb   : > { %4010 = vst.msk [vmem:[%s6561_s19 + $0x168] sm:$0xff] %vm3965_vm1, %v4460_v58  ;;  %v4462_v63 = vadd.f32 %v3871_v62, %v3142_v60 }
 0x2cc   : > { %4011 = vst [vmem:[%s6561_s19 + $0x170] sm:$0xff] %v4461_v61 }
 0x2cd   : > { %4012 = vst.msk [vmem:[%s6561_s19 + $0x178] sm:$0xff] %vm3965_vm1, %v4462_v63 }
 0x2ce   : > { %v3146_v0 = vpop.f32.mrb[48].mxu1 }
 0x2cf   : > { %v3875_v1 = vpop.f32.mrb[48].mxu0  ;;  %v3148_v2 = vpop.f32.mrb[49].mxu1 }
 0x2d0   : > { %v4463_v3 = vadd.f32 %v3875_v1, %v3146_v0  ;;  %v3877_v4 = vpop.f32.mrb[49].mxu0  ;;  %v3150_v5 = vpop.f32.mrb[50].mxu1 }
 0x2d1   : > { %v4464_v6 = vadd.f32 %v3877_v4, %v3148_v2  ;;  %v3879_v7 = vpop.f32.mrb[50].mxu0  ;;  %v3152_v8 = vpop.f32.mrb[51].mxu1 }
 0x2d2   : > { %4013 = vst [vmem:[%s6561_s19 + $0x180] sm:$0xff] %v4463_v3  ;;  %v4465_v9 = vadd.f32 %v3879_v7, %v3150_v5  ;;  %v3881_v10 = vpop.f32.mrb[51].mxu0 }
 0x2d3   : > { %4014 = vst.msk [vmem:[%s6561_s19 + $0x188] sm:$0xff] %vm3965_vm1, %v4464_v6  ;;  %v4466_v11 = vadd.f32 %v3881_v10, %v3152_v8 }
 0x2d4   : > { %4015 = vst [vmem:[%s6561_s19 + $0x190] sm:$0xff] %v4465_v9 }
 0x2d5   : > { %4016 = vst.msk [vmem:[%s6561_s19 + $0x198] sm:$0xff] %vm3965_vm1, %v4466_v11 }
 0x2d6   : > { %v3156_v12 = vpop.f32.mrb[52].mxu1 }
 0x2d7   : > { %v3885_v13 = vpop.f32.mrb[52].mxu0  ;;  %v3158_v14 = vpop.f32.mrb[53].mxu1 }
 0x2d8   : > { %v4467_v15 = vadd.f32 %v3885_v13, %v3156_v12  ;;  %v3887_v16 = vpop.f32.mrb[53].mxu0  ;;  %v3160_v17 = vpop.f32.mrb[54].mxu1 }
 0x2d9   : > { %v4468_v18 = vadd.f32 %v3887_v16, %v3158_v14  ;;  %v3889_v19 = vpop.f32.mrb[54].mxu0  ;;  %v3162_v20 = vpop.f32.mrb[55].mxu1 }
 0x2da   : > { %4017 = vst [vmem:[%s6561_s19 + $0x1a0] sm:$0xff] %v4467_v15  ;;  %v4469_v21 = vadd.f32 %v3889_v19, %v3160_v17  ;;  %v3891_v22 = vpop.f32.mrb[55].mxu0 }
 0x2db   : > { %4018 = vst.msk [vmem:[%s6561_s19 + $0x1a8] sm:$0xff] %vm3965_vm1, %v4468_v18  ;;  %v4470_v23 = vadd.f32 %v3891_v22, %v3162_v20 }
 0x2dc   : > { %4019 = vst [vmem:[%s6561_s19 + $0x1b0] sm:$0xff] %v4469_v21 }
 0x2dd   : > { %4020 = vst.msk [vmem:[%s6561_s19 + $0x1b8] sm:$0xff] %vm3965_vm1, %v4470_v23 }
 0x2de   : > { %v3166_v24 = vpop.f32.mrb[56].mxu1 }
 0x2df   : > { %v3895_v25 = vpop.f32.mrb[56].mxu0  ;;  %v3168_v26 = vpop.f32.mrb[57].mxu1 }
 0x2e0   : > { %v4471_v27 = vadd.f32 %v3895_v25, %v3166_v24  ;;  %v3897_v28 = vpop.f32.mrb[57].mxu0  ;;  %v3170_v29 = vpop.f32.mrb[58].mxu1 }
 0x2e1   : > { %v4472_v30 = vadd.f32 %v3897_v28, %v3168_v26  ;;  %v3899_v31 = vpop.f32.mrb[58].mxu0  ;;  %v3172_v32 = vpop.f32.mrb[59].mxu1 }
 0x2e2   : > { %4021 = vst [vmem:[%s6561_s19 + $0x1c0] sm:$0xff] %v4471_v27  ;;  %v4473_v33 = vadd.f32 %v3899_v31, %v3170_v29  ;;  %v3901_v34 = vpop.f32.mrb[59].mxu0 }
 0x2e3   : > { %4022 = vst.msk [vmem:[%s6561_s19 + $0x1c8] sm:$0xff] %vm3965_vm1, %v4472_v30  ;;  %v4474_v35 = vadd.f32 %v3901_v34, %v3172_v32 }
 0x2e4   : > { %4023 = vst [vmem:[%s6561_s19 + $0x1d0] sm:$0xff] %v4473_v33 }
 0x2e5   : > { %4024 = vst.msk [vmem:[%s6561_s19 + $0x1d8] sm:$0xff] %vm3965_vm1, %v4474_v35 }
 0x2e6   : > { %v3176_v36 = vpop.f32.mrb[60].mxu1 }
 0x2e7   : > { %v3905_v37 = vpop.f32.mrb[60].mxu0  ;;  %v3178_v38 = vpop.f32.mrb[61].mxu1 }
 0x2e8   : > { %v4475_v39 = vadd.f32 %v3905_v37, %v3176_v36  ;;  %v3907_v40 = vpop.f32.mrb[61].mxu0  ;;  %v3180_v41 = vpop.f32.mrb[62].mxu1 }
 0x2e9   : > { %v4476_v42 = vadd.f32 %v3907_v40, %v3178_v38  ;;  %v3909_v43 = vpop.f32.mrb[62].mxu0  ;;  %v3182_v44 = vpop.f32.mrb[63].mxu1 }
 0x2ea   : > { %4025 = vst [vmem:[%s6561_s19 + $0x1e0] sm:$0xff] %v4475_v39  ;;  %v4477_v45 = vadd.f32 %v3909_v43, %v3180_v41  ;;  %v3911_v46 = vpop.f32.mrb[63].mxu0 }
 0x2eb   : > { %4026 = vst.msk [vmem:[%s6561_s19 + $0x1e8] sm:$0xff] %vm3965_vm1, %v4476_v42  ;;  %v4478_v47 = vadd.f32 %v3911_v46, %v3182_v44 }
 0x2ec   : > { %4027 = vst [vmem:[%s6561_s19 + $0x1f0] sm:$0xff] %v4477_v45 }
 0x2ed   : > { %4028 = vst.msk [vmem:[%s6561_s19 + $0x1f8] sm:$0xff] %vm3965_vm1, %v4478_v47 }
 0x2ee   : > { %v3186_v48 = vpop.f32.mrb[64].mxu1 }
 0x2ef   : > { %v3915_v50 = vpop.f32.mrb[64].mxu0  ;;  %v3188_v51 = vpop.f32.mrb[65].mxu1 }
 0x2f0   : > { %v4479_v52 = vadd.f32 %v3915_v50, %v3186_v48  ;;  %v3917_v49 = vpop.f32.mrb[65].mxu0  ;;  %v3190_v53 = vpop.f32.mrb[66].mxu1 }
 0x2f1   : > { %v4480_v54 = vadd.f32 %v3917_v49, %v3188_v51  ;;  %v3919_v55 = vpop.f32.mrb[66].mxu0  ;;  %v3192_v56 = vpop.f32.mrb[67].mxu1 }
 0x2f2   : > { %4029 = vst [vmem:[%s6561_s19 + $0x200] sm:$0xff] %v4479_v52  ;;  %v4481_v57 = vadd.f32 %v3919_v55, %v3190_v53  ;;  %v3921_v58 = vpop.f32.mrb[67].mxu0 }
 0x2f3   : > { %4030 = vst.msk [vmem:[%s6561_s19 + $0x208] sm:$0xff] %vm3965_vm1, %v4480_v54  ;;  %v4482_v59 = vadd.f32 %v3921_v58, %v3192_v56 }
 0x2f4   : > { %4031 = vst [vmem:[%s6561_s19 + $0x210] sm:$0xff] %v4481_v57 }
 0x2f5   : > { %4032 = vst.msk [vmem:[%s6561_s19 + $0x218] sm:$0xff] %vm3965_vm1, %v4482_v59 }
 0x2f6   : > { %v3196_v60 = vpop.f32.mrb[68].mxu1 }
 0x2f7   : > { %v3925_v61 = vpop.f32.mrb[68].mxu0  ;;  %v3198_v62 = vpop.f32.mrb[69].mxu1 }
 0x2f8   : > { %v4483_v63 = vadd.f32 %v3925_v61, %v3196_v60  ;;  %v3927_v0 = vpop.f32.mrb[69].mxu0  ;;  %v3200_v1 = vpop.f32.mrb[70].mxu1 }
 0x2f9   : > { %v4484_v2 = vadd.f32 %v3927_v0, %v3198_v62  ;;  %v3929_v3 = vpop.f32.mrb[70].mxu0  ;;  %v3202_v4 = vpop.f32.mrb[71].mxu1 }
 0x2fa   : > { %4033 = vst [vmem:[%s6561_s19 + $0x220] sm:$0xff] %v4483_v63  ;;  %v4485_v5 = vadd.f32 %v3929_v3, %v3200_v1  ;;  %v3931_v6 = vpop.f32.mrb[71].mxu0 }
 0x2fb   : > { %4034 = vst.msk [vmem:[%s6561_s19 + $0x228] sm:$0xff] %vm3965_vm1, %v4484_v2  ;;  %v4486_v7 = vadd.f32 %v3931_v6, %v3202_v4 }
 0x2fc   : > { %4035 = vst [vmem:[%s6561_s19 + $0x230] sm:$0xff] %v4485_v5 }
 0x2fd   : > { %4036 = vst.msk [vmem:[%s6561_s19 + $0x238] sm:$0xff] %vm3965_vm1, %v4486_v7 }
 0x2fe   : > { %v3206_v8 = vpop.f32.mrb[72].mxu1 }
 0x2ff   : > { %v3935_v9 = vpop.f32.mrb[72].mxu0  ;;  %v3208_v10 = vpop.f32.mrb[73].mxu1 }
 0x300   : > { %v4487_v11 = vadd.f32 %v3935_v9, %v3206_v8  ;;  %v3937_v12 = vpop.f32.mrb[73].mxu0  ;;  %v3210_v13 = vpop.f32.mrb[74].mxu1 }
 0x301   : > { %v4488_v14 = vadd.f32 %v3937_v12, %v3208_v10  ;;  %v3939_v15 = vpop.f32.mrb[74].mxu0  ;;  %v3212_v16 = vpop.f32.mrb[75].mxu1 }
 0x302   : > { %4037 = vst [vmem:[%s6561_s19 + $0x240] sm:$0xff] %v4487_v11  ;;  %v4489_v17 = vadd.f32 %v3939_v15, %v3210_v13  ;;  %v3941_v18 = vpop.f32.mrb[75].mxu0 }
 0x303   : > { %4038 = vst.msk [vmem:[%s6561_s19 + $0x248] sm:$0xff] %vm3965_vm1, %v4488_v14  ;;  %v4490_v19 = vadd.f32 %v3941_v18, %v3212_v16 }
 0x304   : > { %4039 = vst [vmem:[%s6561_s19 + $0x250] sm:$0xff] %v4489_v17 }
 0x305   : > { %4040 = vst.msk [vmem:[%s6561_s19 + $0x258] sm:$0xff] %vm3965_vm1, %v4490_v19 }
 0x306   : > { %v3216_v20 = vpop.f32.mrb[76].mxu1 }
 0x307   : > { %v3945_v21 = vpop.f32.mrb[76].mxu0  ;;  %v3218_v22 = vpop.f32.mrb[77].mxu1 }
 0x308   : > { %v4491_v23 = vadd.f32 %v3945_v21, %v3216_v20  ;;  %v3947_v24 = vpop.f32.mrb[77].mxu0  ;;  %v3220_v25 = vpop.f32.mrb[78].mxu1 }
 0x309   : > { %v4492_v26 = vadd.f32 %v3947_v24, %v3218_v22  ;;  %v3949_v27 = vpop.f32.mrb[78].mxu0  ;;  %v3222_v28 = vpop.f32.mrb[79].mxu1 }
 0x30a   : > { %4041 = vst [vmem:[%s6561_s19 + $0x260] sm:$0xff] %v4491_v23  ;;  %v4493_v29 = vadd.f32 %v3949_v27, %v3220_v25  ;;  %v3951_v30 = vpop.f32.mrb[79].mxu0 }
 0x30b   : > { %4042 = vst.msk [vmem:[%s6561_s19 + $0x268] sm:$0xff] %vm3965_vm1, %v4492_v26  ;;  %v4494_v31 = vadd.f32 %v3951_v30, %v3222_v28 }
 0x30c   : > { %4043 = vst [vmem:[%s6561_s19 + $0x270] sm:$0xff] %v4493_v29 }
 0x30d   : > { %4044 = vst.msk [vmem:[%s6561_s19 + $0x278] sm:$0xff] %vm3965_vm1, %v4494_v31 }
 0x30e   : > { %v3226_v32 = vpop.f32.mrb[80].mxu1 }
 0x30f   : > { %v3955_v33 = vpop.f32.mrb[80].mxu0  ;;  %v3228_v34 = vpop.f32.mrb[81].mxu1 }
 0x310   : > { %v4495_v35 = vadd.f32 %v3955_v33, %v3226_v32  ;;  %v3957_v36 = vpop.f32.mrb[81].mxu0  ;;  %v3230_v37 = vpop.f32.mrb[82].mxu1 }
 0x311   : > { %v4496_v38 = vadd.f32 %v3957_v36, %v3228_v34  ;;  %v3959_v39 = vpop.f32.mrb[82].mxu0  ;;  %v3232_v40 = vpop.f32.mrb[83].mxu1 }
 0x312   : > { %4045 = vst [vmem:[%s6561_s19 + $0x280] sm:$0xff] %v4495_v35  ;;  %v4497_v41 = vadd.f32 %v3959_v39, %v3230_v37  ;;  %v3961_v42 = vpop.f32.mrb[83].mxu0 }
 0x313   : > { %4046 = vst.msk [vmem:[%s6561_s19 + $0x288] sm:$0xff] %vm3965_vm1, %v4496_v38  ;;  %v4498_v43 = vadd.f32 %v3961_v42, %v3232_v40 }
 0x314   : > { %4047 = vst [vmem:[%s6561_s19 + $0x290] sm:$0xff] %v4497_v41 }
 0x315   : > { %4048 = vst.msk [vmem:[%s6561_s19 + $0x298] sm:$0xff] %vm3965_vm1, %v4498_v43 }
 0x316 PF: > { %s12_s11 = sadd.s32 1, %s5219_s11   ;;  %s6702_s9 = smov %s5215_s10 }
 0x317   : > { %p9_p5 = scmp.ge.s32.totalorder %s12_s11, 6   ;;  %s6703_s10 = smov %s6705_s12 }
 0x319   :  { %11 = sbr.rel (!%p9_p5) target bundleno = 2 (0x2), region = 61 }

</bundles_post_ra>
